<compile_context>
chip_gen: v5e
topology: v5e:2x2
jax: 0.10.0
libtpu: 0.0.40
codegen_flags: <defaults>
</compile_context>

<pallas_src>
import functools

import jax
import jax.numpy as jnp
from jax.experimental import pallas as pl
from jax.experimental.pallas import tpu as pltpu

KSIZE = 3  # depthwise kernel size (block_args.kernel_size)

# packed column-parameter layout inside cparams: (Cmid, 16)
#   cols 0..8 : depthwise taps (BN1 scale folded), tap t = (dh+1)*3 + (dw+1)
#   col  9    : BN0 bias
#   col 10    : BN1 bias
#   col 11    : SE expand bias
_COL_B0, _COL_B1, _COL_BSE, _NCOLS = 9, 10, 11, 16


def mbconv_kernel(x_ref, pos_ref, w_exp_ref, cpar_ref, w_sr_ref, b_sr_ref,
                  w_se_ref, w_proj_ref, b2_ref, out_ref, *, H, W, mxu_dtype):
    HW = H * W

    x = x_ref[0]                                   # (Cin, HW)
    x_f32 = x.astype(jnp.float32)

    # ---- parameters (one image per grid step, loads are cheap) ----
    cpar = cpar_ref[...]                           # (Cmid, 16) f32, packed
    b0 = cpar[:, _COL_B0:_COL_B0 + 1]              # (Cmid, 1)
    b1 = cpar[:, _COL_B1:_COL_B1 + 1]              # (Cmid, 1)
    b_se = cpar[:, _COL_BSE:_COL_BSE + 1]          # (Cmid, 1)
    taps = [cpar[:, t:t + 1] for t in range(KSIZE * KSIZE)]

    pos = pos_ref[...]                             # (2, HW) int32
    row = pos[0:1, :]                              # (1, HW)
    col = pos[1:2, :]                              # (1, HW)

    # ---- expand 1x1 (+ folded BN0) + swish ---- (bf16 operands, f32 acc)
    h = jnp.dot(w_exp_ref[...], x.astype(mxu_dtype),
                preferred_element_type=jnp.float32) + b0
    h = h * jax.nn.sigmoid(h)                      # (Cmid, HW) f32

    # ---- depthwise 3x3, "same" pad, stride 1 (+ folded BN1) + swish ----
    # separable masks: column masks applied once to the two column-shifted
    # copies, row masks applied once per dh partial sum. roll(x, s)[i]=x[i-s].
    g_m1 = jnp.where(col >= 1, pltpu.roll(h, shift=1, axis=1), 0.0)       # h[j-1]
    g_p1 = jnp.where(col <= W - 2, pltpu.roll(h, shift=HW - 1, axis=1), 0.0)  # h[j+1]

    p_rows = []
    for dh in (-1, 0, 1):
        base = (dh + 1) * KSIZE
        p_rows.append(taps[base] * g_m1 + taps[base + 1] * h + taps[base + 2] * g_p1)

    acc = p_rows[1]                                                        # dh = 0
    acc = acc + jnp.where(row >= 1,
                          pltpu.roll(p_rows[0], shift=W, axis=1), 0.0)     # dh = -1
    acc = acc + jnp.where(row <= H - 2,
                          pltpu.roll(p_rows[2], shift=HW - W, axis=1), 0.0)  # dh = +1
    d = acc + b1
    d = d * jax.nn.sigmoid(d)                      # (Cmid, HW) f32

    # ---- squeeze & excite (tiny GEMVs on VPU/XLU, no MXU drains) ----
    s = jnp.mean(d, axis=1, keepdims=True)                                 # (Cmid, 1)
    r = jnp.sum(w_sr_ref[...] * s, axis=0, keepdims=True) + b_sr_ref[...]  # (1, Csq_p)
    r = r * jax.nn.sigmoid(r)
    g = jnp.sum(w_se_ref[...] * r, axis=1, keepdims=True) + b_se           # (Cmid, 1)
    d = d * jax.nn.sigmoid(g)

    # ---- project 1x1 (+ folded BN2) + identity skip (f32) ----
    y = jnp.dot(w_proj_ref[...], d.astype(mxu_dtype),
                preferred_element_type=jnp.float32) + b2_ref[...]
    y = y + x_f32                                  # id_skip: stride 1, Cin == Cout
    out_ref[0] = y.astype(out_ref.dtype)


def mbconv_forward(x_nchw, p, *, mxu_dtype=jnp.bfloat16):
    B, Cin, H, W = x_nchw.shape
    HW = H * W
    Cmid = p["w_exp"].shape[1]
    Csq = p["w_sr"].shape[1]
    Cout = p["w_proj"].shape[1]
    assert Cin == Cout, "id_skip path requires input_filters == output_filters"
    # TODO(synk): pad HW to a 128 multiple (and extend edge masks / SE mean)
    # for real EfficientNet spatial sizes like 56x56.
    assert HW % 128 == 0, "this kernel keeps H*W lane-dense (multiple of 128)"

    f32 = jnp.float32
    # ---- host-side BN folding into conv weights ----
    w_exp_t = (p["w_exp"] * p["bn0_s"]).astype(f32).T.astype(mxu_dtype)   # (Cmid, Cin)
    w_proj_t = (p["w_proj"] * p["bn2_s"]).astype(f32).T.astype(mxu_dtype)  # (Cout, Cmid)
    b2 = p["bn2_b"].astype(f32).reshape(Cout, 1)

    # packed per-channel column params: 9 dw taps (BN1 folded) + b0 + b1 + b_se
    dw_cols = (p["w_dw"] * p["bn1_s"]).astype(f32)                         # (9, Cmid)
    cparams = jnp.zeros((Cmid, _NCOLS), f32)
    cparams = cparams.at[:, 0:KSIZE * KSIZE].set(dw_cols.T)
    cparams = cparams.at[:, _COL_B0].set(p["bn0_b"].astype(f32).reshape(Cmid))
    cparams = cparams.at[:, _COL_B1].set(p["bn1_b"].astype(f32).reshape(Cmid))
    cparams = cparams.at[:, _COL_BSE].set(p["b_se"].astype(f32).reshape(Cmid))

    # SE weights; squeeze dim zero-padded to a sublane multiple (>= 8)
    csq_p = max(8, ((Csq + 7) // 8) * 8)
    w_sr = jnp.zeros((Cmid, csq_p), f32).at[:, :Csq].set(p["w_sr"].astype(f32))
    b_sr = jnp.zeros((1, csq_p), f32).at[0, :Csq].set(p["b_sr"].astype(f32).reshape(Csq))
    w_se_t = jnp.zeros((Cmid, csq_p), f32).at[:, :Csq].set(p["w_se"].astype(f32).T)

    # per-position (row, col) indices for the depthwise edge masks
    idx = jnp.arange(HW, dtype=jnp.int32)
    pos = jnp.stack([idx // W, idx % W], axis=0)                           # (2, HW)

    x_flat = x_nchw.reshape(B, Cin, HW)            # free reshape, no transpose

    full2 = lambda n: (0, 0)
    grid_spec = pltpu.PrefetchScalarGridSpec(
        num_scalar_prefetch=0,
        grid=(B,),                                                   # 1 image / step
        in_specs=[
            pl.BlockSpec((1, Cin, HW), lambda n: (n, 0, 0)),         # x
            pl.BlockSpec((2, HW), full2),                            # pos (row/col)
            pl.BlockSpec((Cmid, Cin), full2),                        # w_exp (folded, T)
            pl.BlockSpec((Cmid, _NCOLS), full2),                     # packed col params
            pl.BlockSpec((Cmid, csq_p), full2),                      # SE reduce W
            pl.BlockSpec((1, csq_p), full2),                         # SE reduce b
            pl.BlockSpec((Cmid, csq_p), full2),                      # SE expand W (T)
            pl.BlockSpec((Cout, Cmid), full2),                       # w_proj (folded, T)
            pl.BlockSpec((Cout, 1), full2),                          # BN2 bias
        ],
        out_specs=pl.BlockSpec((1, Cout, HW), lambda n: (n, 0, 0)),
    )

    # scheduling hint for XLA around the custom call
    flops = int(2 * B * HW * Cmid * (Cin + KSIZE * KSIZE + Cout) + 4 * B * Cmid * Csq)
    transcendentals = int(B * (2 * Cmid * HW + Cmid + Csq))
    param_bytes = sum(int(a.size) * a.dtype.itemsize
                      for a in (pos, w_exp_t, cparams, w_sr, b_sr, w_se_t, w_proj_t, b2))
    bytes_accessed = int(x_flat.size * x_flat.dtype.itemsize
                         + B * Cout * HW * x_nchw.dtype.itemsize
                         + param_bytes)

    out = pl.pallas_call(
        functools.partial(mbconv_kernel, H=H, W=W, mxu_dtype=mxu_dtype),
        out_shape=jax.ShapeDtypeStruct((B, Cout, HW), x_nchw.dtype),
        grid_spec=grid_spec,
        compiler_params=pltpu.CompilerParams(
            dimension_semantics=("parallel",),       # batch axis -> megacore on v7x
            vmem_limit_bytes=32 * 1024 * 1024),      # raise v5e's 16 MiB scoped default
        cost_estimate=pl.CostEstimate(flops=flops,
                                      transcendentals=transcendentals,
                                      bytes_accessed=bytes_accessed),
    )(x_flat, pos, w_exp_t, cparams, w_sr, b_sr, w_se_t, w_proj_t, b2)
    return out.reshape(B, Cout, H, W)


def init_params(key, cin, expand_ratio, se_ratio, cout, eps=1e-5):
    cmid = cin * expand_ratio
    csq = max(1, int(cin * se_ratio))
    ks = jax.random.split(key, 20)

    def rnd(k, shape, scale=0.1):
        return scale * jax.random.normal(k, shape, jnp.float32)

    def bn_fold(kg, kb, km, kv, c):
        gamma = 1.0 + 0.1 * jax.random.normal(kg, (c,), jnp.float32)
        beta = 0.1 * jax.random.normal(kb, (c,), jnp.float32)
        mean = 0.1 * jax.random.normal(km, (c,), jnp.float32)
        var = jnp.abs(jax.random.normal(kv, (c,), jnp.float32)) + 0.5
        scale = gamma / jnp.sqrt(var + eps)
        bias = beta - mean * scale
        return scale.reshape(1, c), bias.reshape(1, c)

    p = {
        "w_exp": rnd(ks[0], (cin, cmid)),
        "w_dw": rnd(ks[1], (KSIZE * KSIZE, cmid)),
        "w_sr": rnd(ks[2], (cmid, csq)),
        "b_sr": rnd(ks[3], (1, csq)),
        "w_se": rnd(ks[4], (csq, cmid)),
        "b_se": rnd(ks[5], (1, cmid)),
        "w_proj": rnd(ks[6], (cmid, cout)),
    }
    p["bn0_s"], p["bn0_b"] = bn_fold(ks[7], ks[8], ks[9], ks[10], cmid)
    p["bn1_s"], p["bn1_b"] = bn_fold(ks[11], ks[12], ks[13], ks[14], cmid)
    p["bn2_s"], p["bn2_b"] = bn_fold(ks[15], ks[16], ks[17], ks[18], cout)
    return p


def reference_nchw(x_nchw, p):
    """Pure-JAX reference (inference semantics of the PyTorch module)."""
    hi = jax.lax.Precision.HIGHEST
    x = jnp.transpose(x_nchw, (0, 2, 3, 1))
    Cmid = p["w_exp"].shape[1]
    bshape = (1, 1, 1, -1)

    h = jnp.einsum("bhwc,cd->bhwd", x, p["w_exp"], precision=hi)
    h = h * p["bn0_s"].reshape(bshape) + p["bn0_b"].reshape(bshape)
    h = h * jax.nn.sigmoid(h)

    wd = p["w_dw"].reshape(KSIZE, KSIZE, 1, Cmid)
    d = jax.lax.conv_general_dilated(
        h, wd, window_strides=(1, 1), padding=((1, 1), (1, 1)),
        dimension_numbers=("NHWC", "HWIO", "NHWC"), feature_group_count=Cmid,
        precision=hi)
    d = d * p["bn1_s"].reshape(bshape) + p["bn1_b"].reshape(bshape)
    d = d * jax.nn.sigmoid(d)

    s = d.mean(axis=(1, 2))                       # (B, Cmid)
    s = s @ p["w_sr"] + p["b_sr"]
    s = s * jax.nn.sigmoid(s)
    s = s @ p["w_se"] + p["b_se"]
    d = d * jax.nn.sigmoid(s)[:, None, None, :]

    y = jnp.einsum("bhwc,cd->bhwd", d, p["w_proj"], precision=hi)
    y = y * p["bn2_s"].reshape(bshape) + p["bn2_b"].reshape(bshape)
    y = y + x
    return jnp.transpose(y, (0, 3, 1, 2))


if __name__ == "__main__":
    # block_args: input_filters=8, output_filters=8, expand_ratio=4,
    #             kernel_size=3, strides=1, se_ratio=0.25, id_skip=True
    B, Cin, H, W = 2, 8, 16, 16
    expand_ratio, se_ratio, Cout = 4, 0.25, 8

    key = jax.random.PRNGKey(0)
    kx, kp = jax.random.split(key)
    x_nchw = jax.random.normal(kx, (B, Cin, H, W), jnp.float32)
    params = init_params(kp, Cin, expand_ratio, se_ratio, Cout)

    ref = reference_nchw(x_nchw, params)

    # strict correctness check: f32 MXU operands
    out_f32 = jax.block_until_ready(
        mbconv_forward(x_nchw, params, mxu_dtype=jnp.float32))
    assert out_f32.shape == (B, Cout, H, W)
    if not jnp.allclose(out_f32, ref, atol=5e-3, rtol=5e-3):
        raise AssertionError("Pallas MBConv (f32 MXU) mismatch vs JAX reference")

    # production path: bf16 MXU operands, f32 accumulation / residual add
    out_bf16 = jax.block_until_ready(mbconv_forward(x_nchw, params))
    if not jnp.allclose(out_bf16, ref, atol=3e-2, rtol=3e-2):
        raise AssertionError("Pallas MBConv (bf16 MXU) mismatch vs JAX reference")

    # TODO(synk): drop_connect (training-only stochastic depth) and BN
    # running-stat updates are training-mode behaviors; this kernel implements
    # the inference path only.
    print("KERNEL_OK")
</pallas_src>

<mosaic_0001>
module attributes {stable_mosaic.version = 11 : i64} {
  func.func @mbconv_kernel(%arg0: i32, %arg1: memref<1x8x256xf32, #tpu.memory_space<vmem>>, %arg2: memref<2x256xi32, #tpu.memory_space<vmem>>, %arg3: memref<32x8xf32, #tpu.memory_space<vmem>>, %arg4: memref<32x16xf32, #tpu.memory_space<vmem>>, %arg5: memref<32x8xf32, #tpu.memory_space<vmem>>, %arg6: memref<1x8xf32, #tpu.memory_space<vmem>>, %arg7: memref<32x8xf32, #tpu.memory_space<vmem>>, %arg8: memref<8x32xf32, #tpu.memory_space<vmem>>, %arg9: memref<8x1xf32, #tpu.memory_space<vmem>>, %arg10: memref<1x8x256xf32, #tpu.memory_space<vmem>>) attributes {dimension_semantics = [#tpu.dimension_semantics<parallel>], iteration_bounds = array<i64: 2>, scalar_prefetch = 0 : i64, scratch_operands = 0 : i64, tpu.core_type = #tpu.core_type<tc>, window_params = [{transform_indices = @transform_0, window_bounds = array<i64: 1, 8, 256>}, {pipeline_mode = #tpu.pipeline_mode<synchronous>, transform_indices = @transform_1, window_bounds = array<i64: 2, 256>}, {pipeline_mode = #tpu.pipeline_mode<synchronous>, transform_indices = @transform_2, window_bounds = array<i64: 32, 8>}, {pipeline_mode = #tpu.pipeline_mode<synchronous>, transform_indices = @transform_3, window_bounds = array<i64: 32, 16>}, {pipeline_mode = #tpu.pipeline_mode<synchronous>, transform_indices = @transform_4, window_bounds = array<i64: 32, 8>}, {pipeline_mode = #tpu.pipeline_mode<synchronous>, transform_indices = @transform_5, window_bounds = array<i64: 1, 8>}, {pipeline_mode = #tpu.pipeline_mode<synchronous>, transform_indices = @transform_6, window_bounds = array<i64: 32, 8>}, {pipeline_mode = #tpu.pipeline_mode<synchronous>, transform_indices = @transform_7, window_bounds = array<i64: 8, 32>}, {pipeline_mode = #tpu.pipeline_mode<synchronous>, transform_indices = @transform_8, window_bounds = array<i64: 8, 1>}, {transform_indices = @transform_9, window_bounds = array<i64: 1, 8, 256>}]} {
    %c0 = arith.constant 0 : index
    %c0_0 = arith.constant 0 : index
    %c0_1 = arith.constant 0 : index
    %0 = vector.load %arg1[%c0, %c0_0, %c0_1] : memref<1x8x256xf32, #tpu.memory_space<vmem>>, vector<1x8x256xf32>
    %1 = vector.shape_cast %0 : vector<1x8x256xf32> to vector<8x256xf32>
    %c0_2 = arith.constant 0 : index
    %c0_3 = arith.constant 0 : index
    %2 = vector.load %arg4[%c0_2, %c0_3] : memref<32x16xf32, #tpu.memory_space<vmem>>, vector<32x16xf32>
    %3 = vector.extract_strided_slice %2 {offsets = [0, 9], sizes = [32, 1], strides = [1, 1]} : vector<32x16xf32> to vector<32x1xf32>
    %4 = vector.extract_strided_slice %2 {offsets = [0, 10], sizes = [32, 1], strides = [1, 1]} : vector<32x16xf32> to vector<32x1xf32>
    %5 = vector.extract_strided_slice %2 {offsets = [0, 11], sizes = [32, 1], strides = [1, 1]} : vector<32x16xf32> to vector<32x1xf32>
    %6 = vector.extract_strided_slice %2 {offsets = [0, 0], sizes = [32, 1], strides = [1, 1]} : vector<32x16xf32> to vector<32x1xf32>
    %7 = vector.extract_strided_slice %2 {offsets = [0, 1], sizes = [32, 1], strides = [1, 1]} : vector<32x16xf32> to vector<32x1xf32>
    %8 = vector.extract_strided_slice %2 {offsets = [0, 2], sizes = [32, 1], strides = [1, 1]} : vector<32x16xf32> to vector<32x1xf32>
    %9 = vector.extract_strided_slice %2 {offsets = [0, 3], sizes = [32, 1], strides = [1, 1]} : vector<32x16xf32> to vector<32x1xf32>
    %10 = vector.extract_strided_slice %2 {offsets = [0, 4], sizes = [32, 1], strides = [1, 1]} : vector<32x16xf32> to vector<32x1xf32>
    %11 = vector.extract_strided_slice %2 {offsets = [0, 5], sizes = [32, 1], strides = [1, 1]} : vector<32x16xf32> to vector<32x1xf32>
    %12 = vector.extract_strided_slice %2 {offsets = [0, 6], sizes = [32, 1], strides = [1, 1]} : vector<32x16xf32> to vector<32x1xf32>
    %13 = vector.extract_strided_slice %2 {offsets = [0, 7], sizes = [32, 1], strides = [1, 1]} : vector<32x16xf32> to vector<32x1xf32>
    %14 = vector.extract_strided_slice %2 {offsets = [0, 8], sizes = [32, 1], strides = [1, 1]} : vector<32x16xf32> to vector<32x1xf32>
    %c0_4 = arith.constant 0 : index
    %c0_5 = arith.constant 0 : index
    %15 = vector.load %arg2[%c0_4, %c0_5] : memref<2x256xi32, #tpu.memory_space<vmem>>, vector<2x256xi32>
    %16 = vector.extract_strided_slice %15 {offsets = [0, 0], sizes = [1, 256], strides = [1, 1]} : vector<2x256xi32> to vector<1x256xi32>
    %17 = vector.extract_strided_slice %15 {offsets = [1, 0], sizes = [1, 256], strides = [1, 1]} : vector<2x256xi32> to vector<1x256xi32>
    %c0_6 = arith.constant 0 : index
    %c0_7 = arith.constant 0 : index
    %18 = vector.load %arg3[%c0_6, %c0_7] : memref<32x8xf32, #tpu.memory_space<vmem>>, vector<32x8xf32>
    %cst = arith.constant dense<0.000000e+00> : vector<32x256xf32>
    %19 = tpu.matmul %18, %1, %cst {dimension_numbers = #tpu.dot_dimension_numbers<[1], [0], [0], [1], [0, 0, 1, 1], [], []>} : vector<32x8xf32>, vector<8x256xf32>, vector<32x256xf32> -> vector<32x256xf32>
    %20 = vector.broadcast %3 : vector<32x1xf32> to vector<32x256xf32>
    %21 = arith.addf %19, %20 : vector<32x256xf32>
    %22 = arith.negf %21 : vector<32x256xf32>
    %23 = math.exp %22 : vector<32x256xf32>
    %cst_8 = arith.constant 1.000000e+00 : f32
    %24 = vector.broadcast %cst_8 : f32 to vector<32x256xf32>
    %25 = arith.addf %24, %23 : vector<32x256xf32>
    %26 = arith.divf %24, %25 : vector<32x256xf32>
    %27 = arith.mulf %21, %26 : vector<32x256xf32>
    %c1_i32 = arith.constant 1 : i32
    %28 = vector.broadcast %c1_i32 : i32 to vector<1x256xi32>
    %29 = arith.cmpi sge, %17, %28 : vector<1x256xi32>
    %c1_i32_9 = arith.constant 1 : i32
    %30 = tpu.dynamic_rotate %27 by %c1_i32_9 dim 1 : vector<32x256xf32>, i32 -> vector<32x256xf32>
    %cst_10 = arith.constant 0.000000e+00 : f32
    %31 = vector.shape_cast %29 : vector<1x256xi1> to vector<1x256xi1>
    %32 = vector.broadcast %31 : vector<1x256xi1> to vector<32x256xi1>
    %33 = vector.broadcast %cst_10 : f32 to vector<32x256xf32>
    %34 = arith.select %32, %30, %33 : vector<32x256xi1>, vector<32x256xf32>
    %c14_i32 = arith.constant 14 : i32
    %35 = vector.broadcast %c14_i32 : i32 to vector<1x256xi32>
    %36 = arith.cmpi sle, %17, %35 : vector<1x256xi32>
    %c255_i32 = arith.constant 255 : i32
    %37 = tpu.dynamic_rotate %27 by %c255_i32 dim 1 : vector<32x256xf32>, i32 -> vector<32x256xf32>
    %cst_11 = arith.constant 0.000000e+00 : f32
    %38 = vector.shape_cast %36 : vector<1x256xi1> to vector<1x256xi1>
    %39 = vector.broadcast %38 : vector<1x256xi1> to vector<32x256xi1>
    %40 = vector.broadcast %cst_11 : f32 to vector<32x256xf32>
    %41 = arith.select %39, %37, %40 : vector<32x256xi1>, vector<32x256xf32>
    %42 = vector.broadcast %6 : vector<32x1xf32> to vector<32x256xf32>
    %43 = arith.mulf %42, %34 : vector<32x256xf32>
    %44 = vector.broadcast %7 : vector<32x1xf32> to vector<32x256xf32>
    %45 = arith.mulf %44, %27 : vector<32x256xf32>
    %46 = arith.addf %43, %45 : vector<32x256xf32>
    %47 = vector.broadcast %8 : vector<32x1xf32> to vector<32x256xf32>
    %48 = arith.mulf %47, %41 : vector<32x256xf32>
    %49 = arith.addf %46, %48 : vector<32x256xf32>
    %50 = vector.broadcast %9 : vector<32x1xf32> to vector<32x256xf32>
    %51 = arith.mulf %50, %34 : vector<32x256xf32>
    %52 = vector.broadcast %10 : vector<32x1xf32> to vector<32x256xf32>
    %53 = arith.mulf %52, %27 : vector<32x256xf32>
    %54 = arith.addf %51, %53 : vector<32x256xf32>
    %55 = vector.broadcast %11 : vector<32x1xf32> to vector<32x256xf32>
    %56 = arith.mulf %55, %41 : vector<32x256xf32>
    %57 = arith.addf %54, %56 : vector<32x256xf32>
    %58 = vector.broadcast %12 : vector<32x1xf32> to vector<32x256xf32>
    %59 = arith.mulf %58, %34 : vector<32x256xf32>
    %60 = vector.broadcast %13 : vector<32x1xf32> to vector<32x256xf32>
    %61 = arith.mulf %60, %27 : vector<32x256xf32>
    %62 = arith.addf %59, %61 : vector<32x256xf32>
    %63 = vector.broadcast %14 : vector<32x1xf32> to vector<32x256xf32>
    %64 = arith.mulf %63, %41 : vector<32x256xf32>
    %65 = arith.addf %62, %64 : vector<32x256xf32>
    %c1_i32_12 = arith.constant 1 : i32
    %66 = vector.broadcast %c1_i32_12 : i32 to vector<1x256xi32>
    %67 = arith.cmpi sge, %16, %66 : vector<1x256xi32>
    %c16_i32 = arith.constant 16 : i32
    %68 = tpu.dynamic_rotate %49 by %c16_i32 dim 1 : vector<32x256xf32>, i32 -> vector<32x256xf32>
    %cst_13 = arith.constant 0.000000e+00 : f32
    %69 = vector.shape_cast %67 : vector<1x256xi1> to vector<1x256xi1>
    %70 = vector.broadcast %69 : vector<1x256xi1> to vector<32x256xi1>
    %71 = vector.broadcast %cst_13 : f32 to vector<32x256xf32>
    %72 = arith.select %70, %68, %71 : vector<32x256xi1>, vector<32x256xf32>
    %73 = arith.addf %57, %72 : vector<32x256xf32>
    %c14_i32_14 = arith.constant 14 : i32
    %74 = vector.broadcast %c14_i32_14 : i32 to vector<1x256xi32>
    %75 = arith.cmpi sle, %16, %74 : vector<1x256xi32>
    %c240_i32 = arith.constant 240 : i32
    %76 = tpu.dynamic_rotate %65 by %c240_i32 dim 1 : vector<32x256xf32>, i32 -> vector<32x256xf32>
    %cst_15 = arith.constant 0.000000e+00 : f32
    %77 = vector.shape_cast %75 : vector<1x256xi1> to vector<1x256xi1>
    %78 = vector.broadcast %77 : vector<1x256xi1> to vector<32x256xi1>
    %79 = vector.broadcast %cst_15 : f32 to vector<32x256xf32>
    %80 = arith.select %78, %76, %79 : vector<32x256xi1>, vector<32x256xf32>
    %81 = arith.addf %73, %80 : vector<32x256xf32>
    %82 = vector.broadcast %4 : vector<32x1xf32> to vector<32x256xf32>
    %83 = arith.addf %81, %82 : vector<32x256xf32>
    %84 = arith.negf %83 : vector<32x256xf32>
    %85 = math.exp %84 : vector<32x256xf32>
    %cst_16 = arith.constant 1.000000e+00 : f32
    %86 = vector.broadcast %cst_16 : f32 to vector<32x256xf32>
    %87 = arith.addf %86, %85 : vector<32x256xf32>
    %88 = arith.divf %86, %87 : vector<32x256xf32>
    %89 = arith.mulf %83, %88 : vector<32x256xf32>
    %cst_17 = arith.constant dense<0.000000e+00> : vector<32xf32>
    %90 = vector.multi_reduction <add>, %89, %cst_17 [1] : vector<32x256xf32> to vector<32xf32>
    %91 = vector.shape_cast %90 : vector<32xf32> to vector<32x1xf32>
    %cst_18 = arith.constant 2.560000e+02 : f32
    %92 = vector.broadcast %cst_18 : f32 to vector<32x1xf32>
    %93 = arith.divf %91, %92 : vector<32x1xf32>
    %c0_19 = arith.constant 0 : index
    %c0_20 = arith.constant 0 : index
    %94 = vector.load %arg5[%c0_19, %c0_20] : memref<32x8xf32, #tpu.memory_space<vmem>>, vector<32x8xf32>
    %95 = vector.broadcast %93 : vector<32x1xf32> to vector<32x8xf32>
    %96 = arith.mulf %94, %95 : vector<32x8xf32>
    %cst_21 = arith.constant dense<0.000000e+00> : vector<8xf32>
    %97 = vector.multi_reduction <add>, %96, %cst_21 [0] : vector<32x8xf32> to vector<8xf32>
    %98 = vector.shape_cast %97 : vector<8xf32> to vector<1x8xf32>
    %c0_22 = arith.constant 0 : index
    %c0_23 = arith.constant 0 : index
    %99 = vector.load %arg6[%c0_22, %c0_23] : memref<1x8xf32, #tpu.memory_space<vmem>>, vector<1x8xf32>
    %100 = arith.addf %98, %99 : vector<1x8xf32>
    %101 = arith.negf %100 : vector<1x8xf32>
    %102 = math.exp %101 : vector<1x8xf32>
    %cst_24 = arith.constant 1.000000e+00 : f32
    %103 = vector.broadcast %cst_24 : f32 to vector<1x8xf32>
    %104 = arith.addf %103, %102 : vector<1x8xf32>
    %105 = arith.divf %103, %104 : vector<1x8xf32>
    %106 = arith.mulf %100, %105 : vector<1x8xf32>
    %c0_25 = arith.constant 0 : index
    %c0_26 = arith.constant 0 : index
    %107 = vector.load %arg7[%c0_25, %c0_26] : memref<32x8xf32, #tpu.memory_space<vmem>>, vector<32x8xf32>
    %108 = vector.broadcast %106 : vector<1x8xf32> to vector<32x8xf32>
    %109 = arith.mulf %107, %108 : vector<32x8xf32>
    %cst_27 = arith.constant dense<0.000000e+00> : vector<32xf32>
    %110 = vector.multi_reduction <add>, %109, %cst_27 [1] : vector<32x8xf32> to vector<32xf32>
    %111 = vector.shape_cast %110 : vector<32xf32> to vector<32x1xf32>
    %112 = arith.addf %111, %5 : vector<32x1xf32>
    %113 = arith.negf %112 : vector<32x1xf32>
    %114 = math.exp %113 : vector<32x1xf32>
    %cst_28 = arith.constant 1.000000e+00 : f32
    %115 = vector.broadcast %cst_28 : f32 to vector<32x1xf32>
    %116 = arith.addf %115, %114 : vector<32x1xf32>
    %117 = arith.divf %115, %116 : vector<32x1xf32>
    %118 = vector.broadcast %117 : vector<32x1xf32> to vector<32x256xf32>
    %119 = arith.mulf %89, %118 : vector<32x256xf32>
    %c0_29 = arith.constant 0 : index
    %c0_30 = arith.constant 0 : index
    %120 = vector.load %arg8[%c0_29, %c0_30] : memref<8x32xf32, #tpu.memory_space<vmem>>, vector<8x32xf32>
    %cst_31 = arith.constant dense<0.000000e+00> : vector<8x256xf32>
    %121 = tpu.matmul %120, %119, %cst_31 {dimension_numbers = #tpu.dot_dimension_numbers<[1], [0], [0], [1], [0, 0, 1, 1], [], []>} : vector<8x32xf32>, vector<32x256xf32>, vector<8x256xf32> -> vector<8x256xf32>
    %c0_32 = arith.constant 0 : index
    %c0_33 = arith.constant 0 : index
    %122 = vector.load %arg9[%c0_32, %c0_33] : memref<8x1xf32, #tpu.memory_space<vmem>>, vector<8x1xf32>
    %123 = vector.broadcast %122 : vector<8x1xf32> to vector<8x256xf32>
    %124 = arith.addf %121, %123 : vector<8x256xf32>
    %125 = arith.addf %124, %1 : vector<8x256xf32>
    %c0_34 = arith.constant 0 : index
    %c0_35 = arith.constant 0 : index
    %c0_36 = arith.constant 0 : index
    %126 = vector.load %arg10[%c0_34, %c0_35, %c0_36] : memref<1x8x256xf32, #tpu.memory_space<vmem>>, vector<1x8x256xf32>
    %127 = vector.shape_cast %126 : vector<1x8x256xf32> to vector<8x256xf32>
    %128 = vector.shape_cast %125 : vector<8x256xf32> to vector<1x8x256xf32>
    tpu.vector_store %arg10[%c0_34, %c0_35, %c0_36], %128 {strides = array<i32>} : memref<1x8x256xf32, #tpu.memory_space<vmem>>, vector<1x8x256xf32>,
    return
  }
  func.func @transform_0(%arg0: i32) -> (i32, i32, i32) {
    %c0_i32 = arith.constant 0 : i32
    %c0_i32_0 = arith.constant 0 : i32
    %c0_i32_1 = arith.constant 0 : i32
    return %arg0, %c0_i32, %c0_i32_0 : i32, i32, i32
  }
  func.func @transform_1(%arg0: i32) -> (i32, i32) {
    %c0_i32 = arith.constant 0 : i32
    %c0_i32_0 = arith.constant 0 : i32
    %c0_i32_1 = arith.constant 0 : i32
    return %c0_i32, %c0_i32_0 : i32, i32
  }
  func.func @transform_2(%arg0: i32) -> (i32, i32) {
    %c0_i32 = arith.constant 0 : i32
    %c0_i32_0 = arith.constant 0 : i32
    %c0_i32_1 = arith.constant 0 : i32
    return %c0_i32, %c0_i32_0 : i32, i32
  }
  func.func @transform_3(%arg0: i32) -> (i32, i32) {
    %c0_i32 = arith.constant 0 : i32
    %c0_i32_0 = arith.constant 0 : i32
    %c0_i32_1 = arith.constant 0 : i32
    return %c0_i32, %c0_i32_0 : i32, i32
  }
  func.func @transform_4(%arg0: i32) -> (i32, i32) {
    %c0_i32 = arith.constant 0 : i32
    %c0_i32_0 = arith.constant 0 : i32
    %c0_i32_1 = arith.constant 0 : i32
    return %c0_i32, %c0_i32_0 : i32, i32
  }
  func.func @transform_5(%arg0: i32) -> (i32, i32) {
    %c0_i32 = arith.constant 0 : i32
    %c0_i32_0 = arith.constant 0 : i32
    %c0_i32_1 = arith.constant 0 : i32
    return %c0_i32, %c0_i32_0 : i32, i32
  }
  func.func @transform_6(%arg0: i32) -> (i32, i32) {
    %c0_i32 = arith.constant 0 : i32
    %c0_i32_0 = arith.constant 0 : i32
    %c0_i32_1 = arith.constant 0 : i32
    return %c0_i32, %c0_i32_0 : i32, i32
  }
  func.func @transform_7(%arg0: i32) -> (i32, i32) {
    %c0_i32 = arith.constant 0 : i32
    %c0_i32_0 = arith.constant 0 : i32
    %c0_i32_1 = arith.constant 0 : i32
    return %c0_i32, %c0_i32_0 : i32, i32
  }
  func.func @transform_8(%arg0: i32) -> (i32, i32) {
    %c0_i32 = arith.constant 0 : i32
    %c0_i32_0 = arith.constant 0 : i32
    %c0_i32_1 = arith.constant 0 : i32
    return %c0_i32, %c0_i32_0 : i32, i32
  }
  func.func @transform_9(%arg0: i32) -> (i32, i32, i32) {
    %c0_i32 = arith.constant 0 : i32
    %c0_i32_0 = arith.constant 0 : i32
    %c0_i32_1 = arith.constant 0 : i32
    return %arg0, %c0_i32, %c0_i32_0 : i32, i32, i32
  }
}

</mosaic_0001>

<bundles_post_ra>
// kernel: tpu_custom_call.1
= control target key start
LH: loop header
LB: loop body
LE: loop exit
PB: predicated region body
PF: predicated region fallthrough
CT: control target
= control target key end

     0   :  { %14 = vsyncpa [#allocation3], 0  ;;  %s2856_s0 = inlined_call_operand.vmem [shape: f32[2,8,256], index: 0, kind: input, shape index: {}]   ;;  %s2857_s1 = inlined_call_operand.vmem [shape: s32[2,256], index: 1, kind: input, shape index: {}]   ;;  %s2858_s2 = inlined_call_operand.vmem [shape: f32[32,8], index: 2, kind: input, shape index: {}]   ;;  %s2859_s3 = inlined_call_operand.vmem [shape: f32[32,16], index: 3, kind: input, shape index: {}]   ;;  %s2860_s4 = inlined_call_operand.vmem [shape: f32[32,8], index: 4, kind: input, shape index: {}]   ;;  %s2861_s5 = inlined_call_operand.vmem [shape: f32[1,8], index: 5, kind: input, shape index: {}]   ;;  %s2862_s6 = inlined_call_operand.vmem [shape: f32[32,8], index: 6, kind: input, shape index: {}]   ;;  %s2863_s7 = inlined_call_operand.vmem [shape: f32[8,32], index: 7, kind: input, shape index: {}]   ;;  %s2864_s8 = inlined_call_operand.vmem [shape: f32[8,1], index: 8, kind: input, shape index: {}]   ;;  %s2865_s9 = inlined_call_operand.hbm [shape: f32[2,8,256], index: 9, kind: output, shape index: {}]  }
   0x1   :  { %16 = vsyncpa [#allocation3 + $0x1], 0  ;;  %s1912_s30 = smov 0   ;;  %s1914_s10 = smov 0  }
   0x2   :  { %s1916_s11 = smov 0   ;;  %s1918_s12 = smov 0  }
   0x3 LB: > { %s1933_s13 = sadd.s32 4294967295, %s1843_s12   ;;  %s1545_s14 = sadd.s32 4294967294, %s1843_s12   ;;  %s1843_s12 = sphi %s1918_s12, %s2917_s12   ;;  %s1839_s11 = sphi %s1916_s11, %s2916_s11   ;;  %s1835_s10 = sphi %s1914_s10, %s2915_s10   ;;  %s1831_s30 = sphi %s1912_s30, %s2914_s30  }
   0x4   : > { %s1937_s15 = sadd.s32 1, %s1843_s12   ;;  %s223_s16 = sadd.s32 1, %s1839_s11 }
   0x5   : > { %s220_s17 = ssub.s32 %s1843_s12, %s1937_s15  ;;  %p233_p0 = scmp.ne.s32.totalorder %s1839_s11, %s1835_s10 }
   0x6   : > { %p221_p1 = scmp.eq.s32.totalorder %s220_s17, 0  ;;  %p234_p2 = scmp.eq.s32.totalorder %s1933_s13, 1 }
   0x7   : > { %p239_p3 = scmp.ne.s32.totalorder %s1835_s10, %s1831_s30  ;;  %p240_p4 = scmp.eq.s32.totalorder %s1545_s14, 1 }
   0x8   : > { %s1948_s18 = scalar_select %p221_p1, %s1839_s11, %s223_s16  }
   0x9   : > { %p1950_p5 = por %p234_p2, %p233_p0  ;;  %p1954_p6 = por %p240_p4, %p239_p3 }
   0xa   : > { %p1548_p7 = scmp.ge.s32.totalorder %s1843_s12, 1  ;;  %p290_p8 = scmp.lt.s32.totalorder %s1843_s12, 3 }
   0xc   : > { %p291_p9 = pnand %p1548_p7, %p290_p8 }
   0xe   : > { %294 = sbr.rel (%p291_p9) target bundleno = 1101 (0x44d), region = 56 }
  0x13   : > { %v1963_v0 = vld [vmem:[%s2859_s3 + $0x10] sm:$0xff]  ;;  %v1968_v1 = vld [vmem:[%s2859_s3] sm:$0xff]  ;;  %p326_p10 = scmp.lt.s32.totalorder %s1933_s13, 1  ;;  %v2866_v2 = vmov 0   ;;  %v1846_v3 = vmov 9   ;;  %vm362_vm0 = vcmask 64512  }
  0x14   : > { %1650 = vset.pattern.permute.xlu2 %v2866_v2  ;;  %1649 = vset.pattern.permute.xlu1 %v1846_v3  ;;  %v338_v4 = vld [vmem:[%s2858_s2] sm:$0xff]  ;;  %v341_v7 = vld [vmem:[%s2858_s2 + $0x18] sm:$0xff]  ;;  %v1999_v9 = vld [vmem:[%s2859_s3 + $0x8] sm:$0xff]  ;;  %v1847_v10 = vmov 1   ;;  %v1848_v13 = vmov 2   ;;  %v1849_v14 = vmov 7  }
  0x15   : > { %1648 = vset.pattern.permute.xlu0 %v1846_v3  ;;  %354 = vperm.xlu1 %1649, %v1963_v0   ;;  %s327_s25 = scalar_select %p326_p10, %s1933_s13, 1  ;;  %v1992_v8 = vld [vmem:[%s2859_s3 + $0x18] sm:$0xff]  ;;  %v339_v11 = vld [vmem:[%s2858_s2 + $0x8] sm:$0xff]  ;;  %v340_v12 = vld [vmem:[%s2858_s2 + $0x10] sm:$0xff]  ;;  %v1850_v15 = vmov 6   ;;  %v1851_v16 = vmov 8  }
  0x16   : > { %678 = vperm.xlu2 %1650, %v1968_v1   ;;  %344 = vperm.xlu0 %1648, %v1968_v1   ;;  %v1852_v17 = vmov 4   ;;  %v1853_v18 = vmov 5   ;;  %v1854_v19 = vmov 3   ;;  %s1855_s16 = smov 127   ;;  %s1856_s17 = smov 1  }
  0x17   : > { %s1588_s26 = sshll.u32 %s327_s25, 4  ;;  %s1858_s23 = smov 16  }
  0x18   : > { %s1979_s29 = scalar_lea.vmem %s2856_s0, %s1588_s26  ;;  %s1859_s24 = smov 112  }
  0x19   : > { %v331_v5 = vld [vmem:[%s1979_s29] sm:$0xff]  ;;  %v332_v6 = vld [vmem:[%s1979_s29 + $0x8] sm:$0xff]  ;;  %s323_s22 = sand.u32 1, %s1835_s10   ;;  %s1801_s25 = scalar_lea.hbm %s2865_s9, 32 }
  0x1a   : > { %390 = vmatpush.msra.mxu0 %v331_v5  ;;  %1590 = vmatpush.msra.mxu2 %v331_v5 }
  0x1b   : > { %419 = vmatpush.msra.mxu1 %v332_v6  ;;  %1591 = vmatpush.msra.mxu3 %v332_v6 }
  0x1c   : > { %1552 = vmatmul.msk.f32.vlgmr.msra.gmra.mxu0 %vm362_vm0, %v338_v4  ;;  %1555 = vmatmul.msk.f32.vlgmr.msra.gmra.mxu2 %vm362_vm0, %v341_v7 }
  0x1d   : > { %1556 = vmatmul.msk.f32.vlgmr.msra.gmra.mxu1 %vm362_vm0, %v338_v4  ;;  %1559 = vmatmul.msk.f32.vlgmr.msra.gmra.mxu3 %vm362_vm0, %v341_v7 }
  0x1e   : > { %359 = vperm.xlu1 %1649, %v1992_v8   ;;  %1653 = vset.pattern.permute.xlu2 %v1847_v10 }
  0x1f   : > { %349 = vperm.xlu0 %1648, %v1999_v9   ;;  %706 = vperm.xlu2 %1653, %v1999_v9  }
  0x24   : > { %1553 = vmatmul.msk.f32.gmra.mxu0 %vm362_vm0, %v339_v11 }
  0x25   : > { %1557 = vmatmul.msk.f32.gmra.mxu1 %vm362_vm0, %v339_v11 }
  0x26   : > { %1652 = vset.pattern.permute.xlu1 %v1847_v10 }
  0x27   : > { %1651 = vset.pattern.permute.xlu0 %v2866_v2  ;;  %702 = vperm.xlu1 %1652, %v1968_v1  }
  0x28   : > { %1654 = vset.pattern.permute.xlu2 %v2866_v2  ;;  %682 = vperm.xlu0 %1651, %v1999_v9  }
  0x29   : > { %686 = vperm.xlu2 %1654, %v1963_v0  }
  0x2c   : > { %1554 = vmatmul.msk.f32.gmra.mxu0 %vm362_vm0, %v340_v12 }
  0x2d   : > { %1558 = vmatmul.msk.f32.gmra.mxu1 %vm362_vm0, %v340_v12 }
  0x2f   : > { %1655 = vset.pattern.permute.xlu1 %v1848_v13 }
  0x30   : > { %1659 = vset.pattern.permute.xlu0 %v1849_v14  ;;  %734 = vperm.xlu1 %1655, %v1968_v1  }
  0x31   : > { %1656 = vset.pattern.permute.xlu2 %v1848_v13  ;;  %878 = vperm.xlu0 %1659, %v1968_v1  }
  0x32   : > { %738 = vperm.xlu2 %1656, %v1999_v9  }
  0x38   : > { %1657 = vset.pattern.permute.xlu1 %v1850_v15 }
  0x39   : > { %1660 = vset.pattern.permute.xlu0 %v1847_v10  ;;  %854 = vperm.xlu1 %1657, %v1968_v1  }
  0x3a   : > { %1658 = vset.pattern.permute.xlu2 %v1850_v15  ;;  %710 = vperm.xlu0 %1660, %v1963_v0  }
  0x3b   : > { %858 = vperm.xlu2 %1658, %v1999_v9  }
  0x41   : > { %1661 = vset.pattern.permute.xlu1 %v1849_v14 }
  0x42   : > { %714 = vperm.xlu0 %1660, %v1992_v8   ;;  %882 = vperm.xlu1 %1661, %v1999_v9  }
  0x43   : > { %1662 = vset.pattern.permute.xlu2 %v2866_v2 }
  0x44   : > { %690 = vperm.xlu2 %1662, %v1992_v8  }
  0x4a   : > { %1667 = vset.pattern.permute.xlu0 %v1851_v16  ;;  %1663 = vset.pattern.permute.xlu1 %v1848_v13 }
  0x4b   : > { %914 = vperm.xlu0 %1667, %v1999_v9   ;;  %742 = vperm.xlu1 %1663, %v1963_v0  }
  0x4c   : > { %1664 = vset.pattern.permute.xlu2 %v1850_v15 }
  0x4d   : > { %862 = vperm.xlu2 %1664, %v1963_v0  }
  0x53   : > { %922 = vperm.xlu0 %1667, %v1992_v8   ;;  %1665 = vset.pattern.permute.xlu1 %v1849_v14 }
  0x54   : > { %886 = vperm.xlu1 %1665, %v1963_v0  }
  0x55   : > { %1666 = vset.pattern.permute.xlu2 %v1851_v16 }
  0x56   : > { %910 = vperm.xlu2 %1666, %v1968_v1  }
  0x5b   : > { %1674 = vset.pattern.permute.xlu0 %v1852_v17 }
  0x5c   : > { %790 = vperm.xlu0 %1674, %v1968_v1   ;;  %1668 = vset.pattern.permute.xlu1 %v1848_v13 }
  0x5d   : > { %746 = vperm.xlu1 %1668, %v1992_v8  }
  0x5e   : > { %1669 = vset.pattern.permute.xlu2 %v1850_v15 }
  0x5f   : > { %866 = vperm.xlu2 %1669, %v1992_v8  }
  0x64   : > { %1677 = vset.pattern.permute.xlu0 %v1853_v18 }
  0x65   : > { %1670 = vset.pattern.permute.xlu1 %v1849_v14  ;;  %826 = vperm.xlu0 %1677, %v1999_v9  }
  0x66   : > { %890 = vperm.xlu1 %1670, %v1992_v8  }
  0x67   : > { %1671 = vset.pattern.permute.xlu2 %v1851_v16 }
  0x68   : > { %918 = vperm.xlu2 %1671, %v1963_v0  }
  0x6e   : > { %1672 = vset.pattern.permute.xlu1 %v1854_v19 }
  0x6f   : > { %766 = vperm.xlu1 %1672, %v1968_v1  }
  0x70   : > { %1673 = vset.pattern.permute.xlu2 %v1854_v19  ;;  %v2044_v20 = vpop.permute.xlu2 %678 }
  0x71   : > { %770 = vperm.xlu2 %1673, %v1999_v9  }
  0x77   : > { %1675 = vset.pattern.permute.xlu1 %v1852_v17 }
  0x78   : > { %794 = vperm.xlu1 %1675, %v1999_v9  }
  0x79   : > { %774 = vperm.xlu2 %1673, %v1963_v0   ;;  %v2049_v21 = vpop.permute.xlu2 %706 }
  0x80   : > { %798 = vperm.xlu1 %1675, %v1963_v0  }
  0x81   : > { %1676 = vset.pattern.permute.xlu2 %v1853_v18 }
  0x82   : > { %822 = vperm.xlu2 %1676, %v1968_v1  }
  0x83   : > { %v2053_v22 = vpop.permute.xlu2 %686 }
  0x87   : > { %v2055_v23 = vpop.permute.xlu1 %354 }
  0x88   : > { %v345_v24 = vpop.permute.xlu0 %344  ;;  %1678 = vset.pattern.permute.xlu1 %v1854_v19 }
  0x89   : > { %778 = vperm.xlu1 %1678, %v1992_v8  }
  0x8a   : > { %1679 = vset.pattern.permute.xlu2 %v1852_v17 }
  0x8b   : > { %802 = vperm.xlu2 %1679, %v1992_v8  }
  0x8c   : > { %v2059_v25 = vpop.permute.xlu2 %738 }
  0x90   : > { %v360_v26 = vpop.permute.xlu1 %359 }
  0x91   : > { %v350_v27 = vpop.permute.xlu0 %349  ;;  %1680 = vset.pattern.permute.xlu1 %v1853_v18 }
  0x92   : > { %830 = vperm.xlu1 %1680, %v1963_v0  }
  0x95   : > { %v2062_v28 = vpop.permute.xlu2 %858 }
  0x99   : > { %v392_v29 = vpop.f32.mrf.mxu0  ;;  %v2064_v30 = vpop.permute.xlu1 %702 }
  0x9a   : > { %v2066_v31 = vadd.f32 %v392_v29, %v345_v24  ;;  %v421_v32 = vpop.f32.mrf.mxu1  ;;  %v2068_v33 = vpop.permute.xlu0 %682 }
  0x9b   : > { %v2070_v34 = vadd.f32 %v421_v32, %v345_v24 }
  0x9c   : > { %v1560_v35 = vmul.f32 -1.442695, %v2066_v31 }
  0x9d   : > { %v1561_v36 = vmul.f32 -1.442695, %v2070_v34 }
  0x9e   : > { %1689 = vpow2.f32 %v1560_v35  ;;  %v2074_v37 = vpop.permute.xlu2 %690 }
  0x9f   : > { %1691 = vpow2.f32 %v1561_v36  ;;  %v401_v38 = vpop.f32.mrf.mxu2 }
  0xa0   : > { %v2076_v39 = vadd.f32 %v401_v38, %v360_v26  ;;  %v430_v40 = vpop.f32.mrf.mxu3 }
  0xa1   : > { %v2078_v41 = vadd.f32 %v430_v40, %v360_v26  ;;  %v395_v42 = vpop.f32.mrf.mxu0 }
  0xa2   : > { %v1566_v43 = vmul.f32 -1.442695, %v2076_v39  ;;  %v2081_v44 = vadd.f32 %v395_v42, %v350_v27  ;;  %v424_v45 = vpop.f32.mrf.mxu1  ;;  %v2083_v46 = vpop.permute.xlu1 %734 }
  0xa3   : > { %v1567_v47 = vmul.f32 -1.442695, %v2078_v41  ;;  %v2086_v48 = vadd.f32 %v424_v45, %v350_v27  ;;  %v2088_v49 = vpop.permute.xlu0 %878 }
  0xa4   : > { %v1690_v50 = vpop.eup %1689  ;;  %1693 = vpow2.f32 %v1566_v43  ;;  %v1562_v51 = vmul.f32 -1.442695, %v2081_v44 }
  0xa5   : > { %v1692_v52 = vpop.eup %1691  ;;  %v2091_v53 = vadd.f32 1.0, %v1690_v50  ;;  %1695 = vpow2.f32 %v1567_v47  ;;  %v1563_v54 = vmul.f32 -1.442695, %v2086_v48 }
  0xa6   : > { %v2094_v55 = vadd.f32 1.0, %v1692_v52  ;;  %1697 = vpow2.f32 %v1562_v51 }
  0xa7   : > { %1699 = vrcp.f32 %v2091_v53  ;;  %v2097_v56 = vpop.permute.xlu2 %862  ;;  %v474_v58 = vand.u32 2147483647, %v2091_v53  ;;  %v476_v59 = vand.u32 2147483648, %v2091_v53  ;;  %vm470_vm1 = vweird.f32 %v2091_v53 }
  0xa8   : > { %2879 = vst [vmem:[#allocation5_spill] sm:$0xff] %v2097_v56  ;;  %1701 = vrcp.f32 %v2094_v55  ;;  %v489_v62 = vand.u32 2147483647, %v2094_v55  ;;  %v491_v63 = vand.u32 2147483648, %v2094_v55  ;;  %vm485_vm2 = vweird.f32 %v2094_v55 }
  0xa9   : > { %1703 = vpow2.f32 %v1563_v54  ;;  %v398_v60 = vpop.f32.mrf.mxu0  ;;  %vm2119_vm3 = vcmp.eq.f32.partialorder %v474_v58, 8.507059e+37  ;;  %v477_v14 = vor.u32 1.1754944e-38, %v476_v59 }
  0xaa   : > { %v1694_v57 = vpop.eup %1693  ;;  %v427_v6 = vpop.f32.mrf.mxu1  ;;  %v2116_v10 = vadd.f32 %v398_v60, %v2055_v23  ;;  %vm2125_vm4 = vcmp.eq.f32.partialorder %v489_v62, 8.507059e+37  ;;  %v492_v18 = vor.u32 1.1754944e-38, %v491_v63 }
  0xab   : > { %v1696_v61 = vpop.eup %1695  ;;  %v2104_v0 = vadd.f32 1.0, %v1694_v57  ;;  %v2106_v3 = vpop.permute.xlu1 %854  ;;  %v2130_v19 = vadd.f32 %v427_v6, %v2055_v23 }
  0xac   : > { %v1698_v4 = vpop.eup %1697  ;;  %v2108_v5 = vadd.f32 1.0, %v1696_v61  ;;  %v2110_v7 = vpop.permute.xlu0 %710  ;;  %v1564_v38 = vmul.f32 -1.442695, %v2116_v10 }
  0xad   : > { %v1700_v9 = vpop.eup %1699  ;;  %1705 = vrcp.f32 %v2104_v0  ;;  %v564_v26 = vand.u32 2147483647, %v2104_v0  ;;  %v566_v27 = vand.u32 2147483648, %v2104_v0  ;;  %v2134_v29 = vadd.f32 1.0, %v1698_v4 }
  0xae   : > { %v1702_v11 = vpop.eup %1701  ;;  %v466_v12 = vmul.f32 %v1700_v9, %v2091_v53  ;;  %1707 = vrcp.f32 %v2108_v5  ;;  %vm471_vm5 = vweird.f32 %v1700_v9  ;;  %v579_v42 = vand.u32 2147483647, %v2108_v5 }
  0xaf   : > { %v1704_v15 = vpop.eup %1703  ;;  %v481_v16 = vmul.f32 %v1702_v11, %v2094_v55  ;;  %v581_v23 = vand.u32 2147483648, %v2108_v5  ;;  %1709 = vrcp.f32 %v2134_v29  ;;  %vm486_vm6 = vweird.f32 %v1702_v11  ;;  %vm472_vm10 = vmor %vm470_vm1, %vm471_vm5 }
  0xb0   : > { %v467_v24 = vsub.f32 1.0, %v466_v12  ;;  %v2136_v32 = vpop.permute.xlu2 %910  ;;  %v2138_v36 = vadd.f32 1.0, %v1704_v15  ;;  %vm560_vm7 = vweird.f32 %v2104_v0  ;;  %vm575_vm8 = vweird.f32 %v2108_v5  ;;  %vm487_vm11 = vmor %vm485_vm2, %vm486_vm6 }
  0xb1   : > { %v482_v35 = vsub.f32 1.0, %v481_v16  ;;  %vm2147_vm9 = vcmp.eq.f32.partialorder %v564_v26, 8.507059e+37  ;;  %v567_v54 = vor.u32 1.1754944e-38, %v566_v27  ;;  %v1565_v61 = vmul.f32 -1.442695, %v2130_v19 }
  0xb2   : > { %v468_v40 = vmul.f32 %v1700_v9, %v467_v24  ;;  %1711 = vrcp.f32 %v2138_v36  ;;  %vm2164_vm12 = vcmp.eq.f32.partialorder %v579_v42, 8.507059e+37  ;;  %v582_v6 = vor.u32 1.1754944e-38, %v581_v23 }
  0xb3   : > { %v1706_v43 = vpop.eup %1705  ;;  %v483_v45 = vmul.f32 %v1702_v11, %v482_v35  ;;  %1713 = vpow2.f32 %v1564_v38  ;;  %vm500_vm13 = vweird.f32 %v2134_v29  ;;  %v504_v16 = vand.u32 2147483647, %v2134_v29 }
  0xb4   : > { %v1708_v47 = vpop.eup %1707  ;;  %v469_v50 = vadd.f32 %v1700_v9, %v468_v40  ;;  %v556_v51 = vmul.f32 %v1706_v43, %v2104_v0  ;;  %v2152_v57 = vpop.permute.xlu0 %714  ;;  %vm561_vm14 = vweird.f32 %v1706_v43  ;;  %v506_v17 = vand.u32 2147483648, %v2134_v29 }
  0xb5   : > { %v2154_v58 = vpop.permute.xlu1 %882  ;;  %v484_v59 = vadd.f32 %v1702_v11, %v483_v45  ;;  %v571_v60 = vmul.f32 %v1708_v47, %v2108_v5  ;;  %vm576_vm15 = vweird.f32 %v1708_v47  ;;  %vm562_vm1 = vmor %vm560_vm7, %vm561_vm14  ;;  %1715 = vpow2.f32 %v1565_v61 }
  0xb6   : > { %v473_v62 = vsel %vm472_vm10, %v1700_v9, %v469_v50  ;;  %v557_v63 = vsub.f32 1.0, %v556_v51  ;;  %v1710_v9 = vpop.eup %1709  ;;  %vm577_vm2 = vmor %vm575_vm8, %vm576_vm15  ;;  %vm505_vm6 = vcmp.eq.f32.partialorder %v504_v16, 8.507059e+37  ;;  %vm515_vm7 = vweird.f32 %v2138_v36 }
  0xb7   : > { %v478_v53 = vsel %vm2119_vm3, %v477_v14, %v473_v62  ;;  %v488_v12 = vsel %vm487_vm11, %v1702_v11, %v484_v59  ;;  %v572_v15 = vsub.f32 1.0, %v571_v60  ;;  %v496_v11 = vmul.f32 %v1710_v9, %v2134_v29 }
  0xb8   : > { %v2173_v24 = vmul.f32 %v478_v53, %v2066_v31  ;;  %v493_v55 = vsel %vm2125_vm4, %v492_v18, %v488_v12  ;;  %v558_v26 = vmul.f32 %v1706_v43, %v557_v63  ;;  %v1712_v35 = vpop.eup %1711  ;;  %v519_v18 = vand.u32 2147483647, %v2138_v36 }
  0xb9   : > { %v2178_v27 = vmul.f32 %v493_v55, %v2070_v34  ;;  %v573_v13 = vmul.f32 %v1708_v47, %v572_v15  ;;  %v2181_v14 = vpop.permute.xlu2 %866  ;;  %v1714_v34 = vpop.eup %1713  ;;  %v497_v23 = vsub.f32 1.0, %v496_v11  ;;  %v511_v45 = vmul.f32 %v1712_v35, %v2138_v36 }
  0xba   : > { %v559_v38 = vadd.f32 %v1706_v43, %v558_v26  ;;  %v2185_v31 = vmul.f32 %v2064_v30, %v2173_v24  ;;  %637 = vrot.lane.b32.xlu1 %v2173_v24, %s1855_s16  ;;  %594 = vrot.lane.b32.xlu2 %v2173_v24, %s1856_s17  ;;  %vm501_vm3 = vweird.f32 %v1710_v9  ;;  %v2208_v0 = vmul.f32 %v2088_v49, %v2173_v24 }
  0xbb   : > { %v574_v40 = vadd.f32 %v1708_v47, %v573_v13  ;;  %v2198_v42 = vmul.f32 %v2064_v30, %v2178_v27  ;;  %602 = vrot.lane.b32.xlu0 %v2178_v27, %s1856_s17  ;;  %v2212_v30 = vmul.f32 %v2088_v49, %v2178_v27  ;;  %v498_v60 = vmul.f32 %v1710_v9, %v497_v23  ;;  %vm502_vm5 = vmor %vm500_vm13, %vm501_vm3 }
  0xbc   : > { %v563_v50 = vsel %vm562_vm1, %v1706_v43, %v559_v38  ;;  %v512_v62 = vsub.f32 1.0, %v511_v45  ;;  %v521_v53 = vand.u32 2147483648, %v2138_v36  ;;  %v461_v12 = vadd.f32 1.0, %v1714_v34  ;;  %v1716_v36 = vpop.eup %1715 }
  0xbd   : > { %v568_v51 = vsel %vm2147_vm9, %v567_v54, %v563_v50  ;;  %v578_v59 = vsel %vm577_vm2, %v1708_v47, %v574_v40  ;;  %v2216_v43 = vpop.permute.xlu0 %914  ;;  %v2218_v63 = vpop.permute.xlu1 %742  ;;  %v499_v15 = vadd.f32 %v1710_v9, %v498_v60  ;;  %vm516_vm4 = vweird.f32 %v1712_v35 }
  0xbe   : > { %2888 = vst [vmem:[#allocation6_spill] sm:$0xff] %v2218_v63  ;;  %v583_v5 = vsel %vm2164_vm12, %v582_v6, %v578_v59  ;;  %v513_v52 = vmul.f32 %v1712_v35, %v512_v62  ;;  %v2227_v47 = vmul.f32 %v568_v51, %v2076_v39  ;;  %v507_v54 = vor.u32 1.1754944e-38, %v506_v17  ;;  %vm517_vm8 = vmor %vm515_vm7, %vm516_vm4 }
  0xbf   : > { %v2224_v49 = vmul.f32 %v583_v5, %v2078_v41  ;;  %1717 = vrcp.f32 %v461_v12  ;;  %v503_v4 = vsel %vm502_vm5, %v1710_v9, %v499_v15  ;;  %v522_v55 = vor.u32 1.1754944e-38, %v521_v53 }
  0xc0   : > { %v514_v6 = vadd.f32 %v1712_v35, %v513_v52  ;;  %v508_v61 = vsel %vm505_vm6, %v507_v54, %v503_v4  ;;  %vm520_vm9 = vcmp.eq.f32.partialorder %v519_v18, 8.507059e+37  ;;  %v462_v13 = vadd.f32 1.0, %v1716_v36 }
  0xc1   : > { %v2235_v41 = vmul.f32 %v2152_v57, %v2224_v49  ;;  %v2244_v29 = vmul.f32 %v508_v61, %v2081_v44  ;;  %v536_v40 = vand.u32 2147483648, %v461_v12  ;;  %v534_v23 = vand.u32 2147483647, %v461_v12 }
  0xc2   : > { %600 = vrot.lane.b32.xlu1 %v2227_v47, %s1856_s17  ;;  %608 = vrot.lane.b32.xlu2 %v2224_v49, %s1856_s17  ;;  %v2241_v39 = vpop.permute.xlu2 %918  ;;  %v518_v16 = vsel %vm517_vm8, %v1712_v35, %v514_v6  ;;  %1719 = vrcp.f32 %v462_v13  ;;  %vm530_vm11 = vweird.f32 %v461_v12  ;;  %v551_v6 = vand.u32 2147483648, %v462_v13 }
  0xc3   : > { %2889 = vst [vmem:[#allocation7_spill] sm:$0xff] %v2241_v39  ;;  %645 = vrot.lane.b32.xlu0 %v2178_v27, %s1855_s16  ;;  %v523_v9 = vsel %vm520_vm9, %v522_v55, %v518_v16  ;;  %v2253_v11 = vmul.f32 %v2154_v58, %v2244_v29  ;;  %v537_v59 = vor.u32 1.1754944e-38, %v536_v40  ;;  %vm535_vm13 = vcmp.eq.f32.partialorder %v534_v23, 8.507059e+37 }
  0xc4   : > { %v2249_v26 = vmul.f32 %v523_v9, %v2086_v48  ;;  %v549_v61 = vand.u32 2147483647, %v462_v13  ;;  %vm545_vm15 = vweird.f32 %v462_v13 }
  0xc5   : > { %v2255_v38 = vpop.permute.xlu0 %922  ;;  %v1718_v17 = vpop.eup %1717 }
  0xc6   : > { %2890 = vst [vmem:[#allocation8_spill] sm:$0xff] %v2249_v26  ;;  %v887_v44 = vpop.permute.xlu1 %886  ;;  %v526_v34 = vmul.f32 %v1718_v17, %v461_v12  ;;  %v2259_v35 = vmul.f32 %v2154_v58, %v2249_v26  ;;  %vm531_vm10 = vweird.f32 %v1718_v17  ;;  %vm550_vm2 = vcmp.eq.f32.partialorder %v549_v61, 8.507059e+37 }
  0xc7   : > { %vm532_vm12 = vmor %vm530_vm11, %vm531_vm10 }
  0xc8   : > { %2891 = vst [vmem:[#allocation9_spill] sm:$0xff] %v2259_v35  ;;  %v527_v18 = vsub.f32 1.0, %v526_v34  ;;  %v1720_v50 = vpop.eup %1719 }
  0xc9   : > { %v541_v58 = vmul.f32 %v1720_v50, %v462_v13  ;;  %vm546_vm14 = vweird.f32 %v1720_v50 }
  0xca   : > { %651 = vrot.lane.b32.xlu1 %v2224_v49, %s1855_s16  ;;  %643 = vrot.lane.b32.xlu2 %v2227_v47, %s1855_s16  ;;  %v528_v48 = vmul.f32 %v1718_v17, %v527_v18  ;;  %vm547_vm1 = vmor %vm545_vm15, %vm546_vm14 }
  0xcb   : > { %v2265_v45 = vpop.permute.xlu2 %770  ;;  %v542_v54 = vsub.f32 1.0, %v541_v58 }
  0xcc   : > { %v529_v51 = vadd.f32 %v1718_v17, %v528_v48 }
  0xcd   : > { %v543_v12 = vmul.f32 %v1720_v50, %v542_v54  ;;  %v1857_v54 = vmov 10  }
  0xce   : > { %v791_v60 = vpop.permute.xlu0 %790  ;;  %v533_v62 = vsel %vm532_vm12, %v1718_v17, %v529_v51  ;;  %1681 = vset.pattern.permute.xlu1 %v1857_v54  ;;  %1682 = vset.pattern.permute.xlu2 %v1857_v54 }
  0xcf   : > { %v2268_v5 = vmul.f32 %v791_v60, %v2173_v24  ;;  %v2271_v53 = vmul.f32 %v791_v60, %v2178_v27  ;;  %v2273_v15 = vpop.permute.xlu1 %746  ;;  %v538_v52 = vsel %vm535_vm13, %v537_v59, %v533_v62  ;;  %v544_v16 = vadd.f32 %v1720_v50, %v543_v12 }
  0xd0   : > { %v589_v4 = vmul.f32 %v538_v52, %v2116_v10  ;;  %v552_v10 = vor.u32 1.1754944e-38, %v551_v6  ;;  %v337_v6 = vld [vmem:[%s2857_s1] sm:$0xf] }
  0xd1   : > { %v548_v36 = vsel %vm547_vm1, %v1720_v50, %v544_v16  ;;  %vm593_vm3 = vcmp.ge.s32.totalorder %v337_v6, 1  ;;  %vm636_vm4 = vcmp.le.s32.totalorder %v337_v6, 14 }
  0xd2   : > { %604 = vrot.lane.b32.xlu1 %v2249_v26, %s1856_s17  ;;  %596 = vrot.lane.b32.xlu2 %v2244_v29, %s1856_s17  ;;  %v2281_v24 = vmul.f32 %v2110_v7, %v589_v4  ;;  %v2283_v27 = vmul.f32 %v887_v44, %v589_v4  ;;  %v553_v9 = vsel %vm550_vm2, %v552_v10, %v548_v36  ;;  %v2331_v12 = vsel %vm593_vm3, 1, %v2866_v2 }
  0xd3   : > { %v2285_v55 = vpop.permute.xlu2 %774  ;;  %v590_v17 = vmul.f32 %v553_v9, %v2130_v19  ;;  %2896 = vst [vmem:[#allocation14_spill] sm:$0xff] %v2331_v12  ;;  %v610_v10 = vlaneseq  ;;  %v622_v36 = vperm.slane %v2331_v12, 1 }
  0xd4   : > { %2892 = vst [vmem:[#allocation10_spill] sm:$0xff] %v2281_v24 }
  0xd5   : > { %2893 = vst [vmem:[#allocation11_spill] sm:$0xff] %v2283_v27  ;;  %v2295_v48 = vmul.f32 %v2110_v7, %v590_v17  ;;  %v2297_v23 = vmul.f32 %v887_v44, %v590_v17  ;;  %606 = vrot.lane.b32.xlu0 %v590_v17, %s1856_s17  ;;  %v2339_v9 = vand.u32 127, %v610_v10 }
  0xd7   : > { %2894 = vst [vmem:[#allocation12_spill] sm:$0xff] %v2295_v48  ;;  %v2335_v16 = vpop.permute.xlu0 %826  ;;  %vm612_vm5 = vcmp.lt.s32.totalorder %v2339_v9, 1  ;;  %vm653_vm8 = vcmp.lt.s32.totalorder %v2339_v9, 127  ;;  %vm957_vm11 = vcmp.lt.s32.totalorder %v2339_v9, 16  ;;  %vm1004_vm14 = vcmp.lt.s32.totalorder %v2339_v9, 112 }
  0xd8   : > { %v891_v34 = vpop.permute.xlu1 %890  ;;  %2895 = vst [vmem:[#allocation13_spill] sm:$0xff] %v2297_v23 }
  0xd9   : > { %v2289_v18 = vmul.f32 %v891_v34, %v2227_v47  ;;  %v2292_v40 = vmul.f32 %v891_v34, %v2224_v49 }
  0xda   : > { %647 = vrot.lane.b32.xlu1 %v2249_v26, %s1855_s16  ;;  %639 = vrot.lane.b32.xlu2 %v2244_v29, %s1855_s16 }
  0xdc   : > { %v2304_v19 = vpop.permute.xlu2 %822 }
  0xdd   : > { %641 = vrot.lane.b32.xlu0 %v589_v4, %s1855_s16 }
  0xe1   : > { %v767_v13 = vpop.permute.xlu1 %766 }
  0xe2   : > { %649 = vrot.lane.b32.xlu1 %v590_v17, %s1855_s16  ;;  %598 = vrot.lane.b32.xlu2 %v589_v4, %s1856_s17 }
  0xe5   : > { %v803_v7 = vpop.permute.xlu2 %802  ;;  %834 = vperm.xlu0 %1677, %v1992_v8  }
  0xe6   : > { %v2310_v44 = vmul.f32 %v803_v7, %v2227_v47  ;;  %v2313_v50 = vmul.f32 %v803_v7, %v2224_v49  ;;  %v2346_v7 = vsel %vm636_vm4, 1, %v2866_v2 }
  0xe7   : > { %2898 = vst [vmem:[#allocation16_spill] sm:$0xff] %v2346_v7  ;;  %v664_v6 = vperm.slane %v2346_v7, 3 }
  0xe9   : > { %v2363_v39 = vperm.slane %v664_v6, 1 }
  0xea   : > { %v795_v51 = vpop.permute.xlu1 %794  ;;  %1036 = vperm.xlu1 %1681, %v1968_v1   ;;  %v623_v1 = vperm.slane %v2331_v12, 3 }
  0xeb   : > { %v2317_v59 = vmul.f32 %v795_v51, %v2244_v29  ;;  %v2320_v58 = vmul.f32 %v795_v51, %v2249_v26  ;;  %vm668_vm10 = vcmp.eq.s32.totalorder %v2363_v39, 1 }
  0xec   : > { %v2343_v34 = vperm.slane %v623_v1, 1 }
  0xed   : > { %1683 = vset.pattern.permute.xlu0 %v1857_v54  ;;  %v663_v54 = vperm.slane %v2346_v7, 1 }
  0xee   : > { %vm627_vm7 = vcmp.eq.s32.totalorder %v2343_v34, 1 }
  0xef   : > { %v2361_v27 = vperm.slane %v663_v54, 1 }
  0xf1   : > { %vm667_vm9 = vcmp.eq.s32.totalorder %v2361_v27, 1 }
  0xf2   : > { %v799_v60 = vpop.permute.xlu1 %798 }
  0xf3   : > { %v2322_v62 = vmul.f32 %v799_v60, %v589_v4  ;;  %v2324_v52 = vmul.f32 %v799_v60, %v590_v17  ;;  %v2341_v17 = vperm.slane %v622_v36, 1 }
  0xf5   : > { %vm626_vm6 = vcmp.eq.s32.totalorder %v2341_v17, 1 }
  0xfb   : > { %v779_v8 = vpop.permute.xlu1 %778 }
 0x104   : > { %v2333_v61 = vpop.permute.xlu1 %830 }
 0x105   : > { %2897 = vst [vmem:[#allocation15_spill] sm:$0xff] %v2333_v61 }
 0x114   : > { %v595_v49 = vpop.permute.xlu2 %594 }
 0x11c   : > { %v609_v4 = vpop.permute.xlu2 %608 }
 0x124   : > { %v644_v51 = vpop.permute.xlu2 %643 }
 0x12c   : > { %v638_v60 = vpop.permute.xlu1 %637 }
 0x12d   : > { %v603_v10 = vpop.permute.xlu0 %602 }
 0x12e   : > { %v613_v36 = vsel %vm612_vm5, %v595_v49, %v603_v10  ;;  %v617_v1 = vsel %vm612_vm5, %v603_v10, %v595_v49 }
 0x12f   : > { %v628_v2 = vsel %vm626_vm6, %v617_v1, 0.0  ;;  %v629_v12 = vsel %vm627_vm7, %v613_v36, 0.0 }
 0x130   : > { %v781_v23 = vmul.f32 %v767_v13, %v628_v2  ;;  %v782_v48 = vmul.f32 %v767_v13, %v629_v12  ;;  %v694_v35 = vmul.f32 %v2044_v20, %v629_v12  ;;  %v693_v49 = vmul.f32 %v2044_v20, %v628_v2 }
 0x131   : > { %v869_v10 = vmul.f32 %v2106_v3, %v628_v2 }
 0x132   : > { %v813_v7 = vadd.f32 %v2268_v5, %v781_v23  ;;  %v814_v56 = vadd.f32 %v2271_v53, %v782_v48  ;;  %v597_v53 = vpop.permute.xlu2 %596  ;;  %v726_v1 = vadd.f32 %v2198_v42, %v694_v35 }
 0x134   : > { %v601_v13 = vpop.permute.xlu1 %600 }
 0x135   : > { %v646_v54 = vpop.permute.xlu0 %645  ;;  %v616_v6 = vsel %vm612_vm5, %v601_v13, %v609_v4  ;;  %v620_v5 = vsel %vm612_vm5, %v609_v4, %v601_v13 }
 0x136   : > { %v654_v48 = vsel %vm653_vm8, %v638_v60, %v646_v54  ;;  %v658_v20 = vsel %vm653_vm8, %v646_v54, %v638_v60  ;;  %v2383_v2 = vsel %vm626_vm6, %v620_v5, 0.0  ;;  %v635_v23 = vsel %vm627_vm7, %v616_v6, 0.0 }
 0x137   : > { %v669_v36 = vsel %vm667_vm9, %v654_v48, 0.0  ;;  %v670_v4 = vsel %vm668_vm10, %v658_v20, 0.0  ;;  %v901_v60 = vadd.f32 %v2208_v0, %v869_v10  ;;  %v725_v54 = vadd.f32 %v2185_v31, %v693_v49 }
 0x138   : > { %v749_v13 = vmul.f32 %v2083_v46, %v669_v36  ;;  %v750_v24 = vmul.f32 %v2083_v46, %v670_v4  ;;  %v838_v5 = vmul.f32 %v2304_v19, %v670_v4  ;;  %v925_v6 = vmul.f32 %v2136_v32, %v669_v36 }
 0x139   : > { %v787_v61 = vmul.f32 %v779_v8, %v2383_v2  ;;  %v788_v48 = vmul.f32 %v779_v8, %v635_v23  ;;  %v837_v63 = vmul.f32 %v2304_v19, %v669_v36  ;;  %v699_v42 = vmul.f32 %v2074_v37, %v2383_v2 }
 0x13a   : > { %v758_v20 = vadd.f32 %v750_v24, %v726_v1  ;;  %v757_v26 = vadd.f32 %v749_v13, %v725_v54  ;;  %v876_v46 = vmul.f32 %v2181_v14, %v635_v23  ;;  %v933_v35 = vadd.f32 %v925_v6, %v901_v60 }
 0x13b   : > { %v870_v0 = vmul.f32 %v2106_v3, %v629_v12  ;;  %v2407_v8 = vadd.f32 %v2310_v44, %v787_v61  ;;  %v2410_v24 = vadd.f32 %v2313_v50, %v788_v48  ;;  %v723_v19 = vmul.f32 %v2152_v57, %v2227_v47 }
 0x13c   : > { %949 = vrot.lane.b32.xlu1 %v758_v20, %s1858_s23  ;;  %941 = vrot.lane.b32.xlu2 %v757_v26, %s1858_s23  ;;  %v652_v31 = vpop.permute.xlu1 %651  ;;  %v2419_v26 = vadd.f32 %v838_v5, %v814_v56  ;;  %v926_v44 = vmul.f32 %v2136_v32, %v670_v4  ;;  %v2430_v47 = vadd.f32 %v837_v63, %v813_v7  ;;  %v640_v32 = vpop.permute.xlu2 %639 }
 0x13d   : > { %988 = vrot.lane.b32.xlu0 %v933_v35, %s1859_s24  ;;  %v657_v3 = vsel %vm653_vm8, %v644_v51, %v652_v31  ;;  %v661_v12 = vsel %vm653_vm8, %v652_v31, %v644_v51  ;;  %v731_v56 = vadd.f32 %v723_v19, %v699_v42  ;;  %v908_v49 = vadd.f32 %v2292_v40, %v876_v46 }
 0x13e   : > { %v2424_v50 = vsel %vm667_vm9, %v657_v3, 0.0  ;;  %v2428_v57 = vsel %vm668_vm10, %v661_v12, 0.0  ;;  %v902_v10 = vadd.f32 %v2212_v30, %v870_v0  ;;  %v700_v13 = vmul.f32 %v2074_v37, %v635_v23 }
 0x13f   : > { %v755_v61 = vmul.f32 %v2273_v15, %v2424_v50  ;;  %v932_v51 = vmul.f32 %v2255_v38, %v2428_v57  ;;  %v756_v30 = vmul.f32 %v2273_v15, %v2428_v57  ;;  %v719_v15 = vmul.f32 %v2049_v21, %v2244_v29 }
 0x140   : > { %v934_v1 = vadd.f32 %v926_v44, %v902_v10  ;;  %v732_v5 = vadd.f32 %v2235_v41, %v700_v13  ;;  %v875_v42 = vmul.f32 %v2181_v14, %v2383_v2  ;;  %v931_v35 = vmul.f32 %v2255_v38, %v2424_v50 }
 0x141   : > { %v763_v36 = vadd.f32 %v755_v61, %v731_v56  ;;  %v940_v4 = vadd.f32 %v932_v51, %v908_v49 }
 0x142   : > { %v764_v20 = vadd.f32 %v756_v30, %v732_v5  ;;  %v907_v51 = vadd.f32 %v2289_v18, %v875_v42  ;;  %v2901_v5 = vld [vmem:[#allocation15_spill] sm:$0xff] }
 0x144   : > { %947 = vrot.lane.b32.xlu1 %v763_v36, %s1858_s23  ;;  %996 = vrot.lane.b32.xlu2 %v934_v1, %s1859_s24  ;;  %v605_v63 = vpop.permute.xlu1 %604 }
 0x145   : > { %1002 = vrot.lane.b32.xlu0 %v940_v4, %s1859_s24  ;;  %v614_v7 = vsel %vm612_vm5, %v597_v53, %v605_v63  ;;  %v618_v40 = vsel %vm612_vm5, %v605_v63, %v597_v53  ;;  %v599_v53 = vpop.permute.xlu2 %598  ;;  %v939_v4 = vadd.f32 %v931_v35, %v907_v51 }
 0x146   : > { %v630_v60 = vsel %vm626_vm6, %v618_v40, 0.0  ;;  %v631_v37 = vsel %vm627_vm7, %v614_v7, 0.0 }
 0x147   : > { %v783_v23 = vmul.f32 %v2265_v45, %v630_v60  ;;  %v784_v54 = vmul.f32 %v2265_v45, %v631_v37  ;;  %v607_v46 = vpop.permute.xlu0 %606  ;;  %v695_v45 = vmul.f32 %v2068_v33, %v630_v60  ;;  %v871_v41 = vmul.f32 %v2062_v28, %v630_v60 }
 0x148   : > { %v619_v29 = vsel %vm612_vm5, %v607_v46, %v599_v53  ;;  %v872_v1 = vmul.f32 %v2062_v28, %v631_v37 }
 0x149   : > { %v815_v6 = vadd.f32 %v2317_v59, %v783_v23  ;;  %v816_v48 = vadd.f32 %v2320_v58, %v784_v54  ;;  %v615_v58 = vsel %vm612_vm5, %v599_v53, %v607_v46  ;;  %v632_v38 = vsel %vm626_vm6, %v619_v29, 0.0  ;;  %v2900_v23 = vld [vmem:[#allocation6_spill] sm:$0xff] }
 0x14a   : > { %v633_v0 = vsel %vm627_vm7, %v615_v58, 0.0  ;;  %v785_v3 = vmul.f32 %v2285_v55, %v632_v38  ;;  %v727_v61 = vadd.f32 %v719_v15, %v695_v45  ;;  %v903_v10 = vadd.f32 %v2253_v11, %v871_v41  ;;  %v2904_v45 = vld [vmem:[#allocation5_spill] sm:$0xff] }
 0x14b   : > { %v786_v12 = vmul.f32 %v2285_v55, %v633_v0  ;;  %v696_v55 = vmul.f32 %v2068_v33, %v631_v37  ;;  %v697_v18 = vmul.f32 %v2053_v22, %v632_v38  ;;  %v2899_v33 = vld [vmem:[#allocation8_spill] sm:$0xff]  ;;  %v698_v39 = vmul.f32 %v2053_v22, %v633_v0 }
 0x14c   : > { %955 = vrot.lane.b32.xlu2 %v764_v20, %s1858_s23  ;;  %v648_v59 = vpop.permute.xlu1 %647  ;;  %v817_v17 = vadd.f32 %v2322_v62, %v785_v3  ;;  %v720_v28 = vmul.f32 %v2049_v21, %v2899_v33  ;;  %v2903_v20 = vld [vmem:[#allocation9_spill] sm:$0xff]  ;;  %v873_v41 = vmul.f32 %v2904_v45, %v632_v38 }
 0x14d   : > { %v655_v14 = vsel %vm653_vm8, %v640_v32, %v648_v59  ;;  %v659_v2 = vsel %vm653_vm8, %v648_v59, %v640_v32  ;;  %v818_v34 = vadd.f32 %v2324_v52, %v786_v12  ;;  %v2906_v12 = vld [vmem:[#allocation11_spill] sm:$0xff] }
 0x14e   : > { %v671_v31 = vsel %vm667_vm9, %v655_v14, 0.0  ;;  %v672_v19 = vsel %vm668_vm10, %v659_v2, 0.0  ;;  %v728_v15 = vadd.f32 %v720_v28, %v696_v55  ;;  %v874_v14 = vmul.f32 %v2904_v45, %v633_v0 }
 0x14f   : > { %v751_v44 = vmul.f32 %v2059_v25, %v671_v31  ;;  %v839_v56 = vmul.f32 %v2335_v16, %v671_v31  ;;  %v840_v49 = vmul.f32 %v2335_v16, %v672_v19  ;;  %v927_v32 = vmul.f32 %v2216_v43, %v671_v31  ;;  %v642_v13 = vpop.permute.xlu0 %641  ;;  %v2905_v31 = vld [vmem:[#allocation7_spill] sm:$0xff] }
 0x150   : > { %v752_v40 = vmul.f32 %v2059_v25, %v672_v19  ;;  %v928_v30 = vmul.f32 %v2216_v43, %v672_v19  ;;  %v904_v25 = vadd.f32 %v2903_v20, %v872_v1  ;;  %v2910_v1 = vld [vmem:[#allocation16_spill] sm:$0xff] }
 0x151   : > { %v759_v36 = vadd.f32 %v751_v44, %v727_v61  ;;  %v935_v62 = vadd.f32 %v927_v32, %v903_v10  ;;  %v2497_v16 = vadd.f32 %v839_v56, %v815_v6  ;;  %v2505_v7 = vadd.f32 %v840_v49, %v816_v48  ;;  %v2902_v48 = vld [vmem:[#allocation10_spill] sm:$0xff]  ;;  %v2907_v44 = vld [vmem:[#allocation12_spill] sm:$0xff]  ;;  %v2908_v61 = vld [vmem:[#allocation13_spill] sm:$0xff] }
 0x152   : > { %v729_v53 = vadd.f32 %v2902_v48, %v697_v18  ;;  %v936_v46 = vadd.f32 %v928_v30, %v904_v25  ;;  %v760_v35 = vadd.f32 %v752_v40, %v728_v15  ;;  %v906_v0 = vadd.f32 %v2908_v61, %v874_v14  ;;  %v2561_v56 = vld [vmem:[%s2859_s3 + $0x18] sm:$0xff] }
 0x153   : > { %943 = vrot.lane.b32.xlu0 %v759_v36, %s1858_s23  ;;  %990 = vrot.lane.b32.xlu1 %v935_v62, %s1859_s24  ;;  %v2909_v36 = vld [vmem:[#allocation14_spill] sm:$0xff]  ;;  %v1013_v18 = vperm.slane %v2910_v1, 0 }
 0x154   : > { %994 = vrot.lane.b32.xlu2 %v939_v4, %s1859_s24  ;;  %v650_v52 = vpop.permute.xlu1 %649  ;;  %v966_v4 = vperm.slane %v2909_v36, 0  ;;  %v967_v55 = vperm.slane %v2909_v36, 2 }
 0x155   : > { %v656_v11 = vsel %vm653_vm8, %v642_v13, %v650_v52  ;;  %v660_v63 = vsel %vm653_vm8, %v650_v52, %v642_v13  ;;  %v1014_v13 = vperm.slane %v2910_v1, 2 }
 0x156   : > { %v673_v60 = vsel %vm667_vm9, %v656_v11, 0.0  ;;  %v674_v37 = vsel %vm668_vm10, %v660_v63, 0.0  ;;  %v2568_v62 = vperm.slane %v966_v4, 0  ;;  %v2570_v52 = vperm.slane %v967_v55, 0 }
 0x157   : > { %v753_v54 = vmul.f32 %v2900_v23, %v673_v60  ;;  %v841_v6 = vmul.f32 %v2901_v5, %v673_v60  ;;  %v842_v21 = vmul.f32 %v2901_v5, %v674_v37  ;;  %v835_v59 = vpop.permute.xlu0 %834  ;;  %v754_v2 = vmul.f32 %v2900_v23, %v674_v37 }
 0x158   : > { %v843_v58 = vmul.f32 %v835_v59, %v2424_v50  ;;  %v844_v29 = vmul.f32 %v835_v59, %v2428_v57  ;;  %v929_v19 = vmul.f32 %v2905_v31, %v673_v60  ;;  %v930_v3 = vmul.f32 %v2905_v31, %v674_v37 }
 0x159   : > { %v2519_v43 = vadd.f32 %v841_v6, %v817_v17  ;;  %v2521_v42 = vadd.f32 %v842_v21, %v818_v34  ;;  %v761_v27 = vadd.f32 %v753_v54, %v729_v53  ;;  %v905_v50 = vadd.f32 %v2906_v12, %v873_v41 }
 0x15a   : > { %v2534_v22 = vadd.f32 %v843_v58, %v2407_v8  ;;  %v2537_v38 = vadd.f32 %v844_v29, %v2410_v24  ;;  %v730_v57 = vadd.f32 %v2907_v44, %v698_v39  ;;  %v938_v34 = vadd.f32 %v930_v3, %v906_v0  ;;  %v2549_v8 = vld [vmem:[%s2859_s3 + $0x10] sm:$0xff]  ;;  %v2555_v24 = vld [vmem:[%s2859_s3 + $0x8] sm:$0xff] }
 0x15b   : > { %998 = vrot.lane.b32.xlu0 %v936_v46, %s1859_s24  ;;  %945 = vrot.lane.b32.xlu1 %v761_v27, %s1858_s23  ;;  %v937_v51 = vadd.f32 %v929_v19, %v905_v50  ;;  %v2574_v63 = vperm.slane %v1013_v18, 0  ;;  %v2576_v33 = vperm.slane %v1014_v13, 0  ;;  %vm970_vm12 = vcmp.eq.s32.totalorder %v2568_v62, 1 }
 0x15c   : > { %951 = vrot.lane.b32.xlu2 %v760_v35, %s1858_s23  ;;  %v762_v17 = vadd.f32 %v754_v2, %v730_v57  ;;  %v1037_v10 = vpop.permute.xlu1 %1036  ;;  %vm971_vm13 = vcmp.eq.s32.totalorder %v2570_v52, 1 }
 0x15d   : > { %vm1017_vm15 = vcmp.eq.s32.totalorder %v2574_v63, 1  ;;  %vm1018_vm1 = vcmp.eq.s32.totalorder %v2576_v33, 1 }
 0x163   : > { %992 = vrot.lane.b32.xlu0 %v937_v51, %s1859_s24  ;;  %1000 = vrot.lane.b32.xlu1 %v938_v34, %s1859_s24  ;;  %s1589_s24 = sshll.u32 %s1933_s13, 4  ;;  %s1470_s13 = scalar_lea.sflag [#allocation3], %s323_s22 }
 0x164   : > { %953 = vrot.lane.b32.xlu2 %v762_v17, %s1858_s23  ;;  %s1549_s23 = sshll.u32 %s323_s22, 4  ;;  %s1481_s27 = scalar_lea.hbm %s2865_s9, %s1589_s24 }
 0x165   : > { %s325_s28 = scalar_lea.vmem [#allocation2], %s1549_s23  ;;  %s1485_s16 = sshll.u32 %s1481_s27, 4  ;;  %s1486_s16 = int_to_ptr.hbm [resolvable:$true] %s1485_s16 }
 0x166   : > { %s1483_s14 = sshll.u32 %s325_s28, 4  ;;  %s1795_s17 = sshra.s32 %s1486_s16, 4  ;;  %s1484_s14 = int_to_ptr.vmem [resolvable:$true] %s1483_s14  ;;  %s1796_s17 = int_to_ptr.hbm [resolvable:$true] %s1795_s17 }
 0x167   : > { %s1797_s21 = scalar_lea.hbm %s1796_s17, 16  ;;  %p1802_p0 = scmp.lt.s32.totalorder %s1796_s17, %s2865_s9 }
 0x168   : > { %p1798_p11 = scmp.ne.s32.totalorder %s1796_s17, %s1797_s21  ;;  %p1803_p1 = scmp.lt.s32.totalorder %s1801_s25, %s1797_s21 }
 0x16a   : > { %p1799_p12 = pnand %p1798_p11, %p1950_p5  ;;  %p1804_p2 = por %p1803_p1, %p1802_p0 }
 0x16b   : > { %1044 = vperm.xlu0 %1683, %v2549_v8   ;;  %1048 = vperm.xlu1 %1681, %v2561_v56  }
 0x16c   : > { %1040 = vperm.xlu2 %1682, %v2555_v24   ;;  %p1800_p13 = pneg %p1799_p12 }
 0x16e   : > { %p1805_p3 = pnand %p1804_p2, %p1800_p13 }
 0x196   : > { %v942_v49 = vpop.permute.xlu2 %941 }
 0x19e   : > { %v997_v32 = vpop.permute.xlu2 %996 }
 0x1a6   : > { %v2572_v11 = vpop.permute.xlu2 %955 }
 0x1ae   : > { %v950_v28 = vpop.permute.xlu1 %949  ;;  %v2602_v15 = vpop.permute.xlu2 %994 }
 0x1af   : > { %v958_v40 = vsel %vm957_vm11, %v942_v49, %v950_v28  ;;  %v962_v30 = vsel %vm957_vm11, %v950_v28, %v942_v49  ;;  %v989_v60 = vpop.permute.xlu0 %988 }
 0x1b0   : > { %v972_v37 = vsel %vm970_vm12, %v962_v30, 0.0  ;;  %v973_v23 = vsel %vm971_vm13, %v958_v40, 0.0  ;;  %v1005_v54 = vsel %vm1004_vm14, %v989_v60, %v997_v32  ;;  %v1009_v5 = vsel %vm1004_vm14, %v997_v32, %v989_v60 }
 0x1b1   : > { %v980_v6 = vadd.f32 %v972_v37, %v2430_v47  ;;  %v981_v21 = vadd.f32 %v973_v23, %v2419_v26  ;;  %v1019_v48 = vsel %vm1017_vm15, %v1005_v54, 0.0  ;;  %v1020_v53 = vsel %vm1018_vm1, %v1009_v5, 0.0 }
 0x1b3   : > { %v1027_v20 = vadd.f32 %v1019_v48, %v980_v6  ;;  %v1028_v25 = vadd.f32 %v1020_v53, %v981_v21 }
 0x1b5   : > { %v2604_v27 = vadd.f32 %v1037_v10, %v1027_v20  ;;  %v2606_v46 = vadd.f32 %v1037_v10, %v1028_v25 }
 0x1b6   : > { %v952_v39 = vpop.permute.xlu2 %951  ;;  %v948_v41 = vpop.permute.xlu1 %947 }
 0x1b7   : > { %v1568_v35 = vmul.f32 -1.442695, %v2604_v27  ;;  %v1569_v47 = vmul.f32 -1.442695, %v2606_v46  ;;  %v2610_v26 = vpop.permute.xlu0 %1002  ;;  %v961_v0 = vsel %vm957_vm11, %v948_v41, %v2572_v11 }
 0x1b8   : > { %v1008_v62 = vsel %vm1004_vm14, %v2602_v15, %v2610_v26 }
 0x1b9   : > { %1721 = vpow2.f32 %v1568_v35 }
 0x1ba   : > { %1723 = vpow2.f32 %v1569_v47 }
 0x1be   : > { %v954_v2 = vpop.permute.xlu2 %953 }
 0x1bf   : > { %v1722_v45 = vpop.eup %1721 }
 0x1c0   : > { %v1724_v59 = vpop.eup %1723  ;;  %v1083_v58 = vadd.f32 1.0, %v1722_v45 }
 0x1c1   : > { %v1084_v29 = vadd.f32 1.0, %v1724_v59 }
 0x1c2   : > { %1725 = vrcp.f32 %v1083_v58  ;;  %vm1096_vm2 = vweird.f32 %v1083_v58  ;;  %v1100_v34 = vand.u32 2147483647, %v1083_v58  ;;  %v1102_v49 = vand.u32 2147483648, %v1083_v58 }
 0x1c3   : > { %1727 = vrcp.f32 %v1084_v29  ;;  %v1115_v10 = vand.u32 2147483647, %v1084_v29  ;;  %v1117_v1 = vand.u32 2147483648, %v1084_v29  ;;  %vm1111_vm6 = vweird.f32 %v1084_v29 }
 0x1c4   : > { %vm1101_vm7 = vcmp.eq.f32.partialorder %v1100_v34, 8.507059e+37  ;;  %v1103_v21 = vor.u32 1.1754944e-38, %v1102_v49  ;;  %v1025_v34 = vsel %vm1017_vm15, %v1008_v62, 0.0 }
 0x1c5   : > { %v944_v14 = vpop.permute.xlu0 %943  ;;  %v991_v31 = vpop.permute.xlu1 %990  ;;  %vm1116_vm9 = vcmp.eq.f32.partialorder %v1115_v10, 8.507059e+37  ;;  %v1118_v25 = vor.u32 1.1754944e-38, %v1117_v1 }
 0x1c6   : > { %v963_v19 = vsel %vm957_vm11, %v952_v39, %v944_v14  ;;  %v959_v12 = vsel %vm957_vm11, %v944_v14, %v952_v39  ;;  %v1041_v37 = vpop.permute.xlu2 %1040 }
 0x1c7   : > { %v974_v57 = vsel %vm970_vm12, %v963_v19, 0.0  ;;  %v975_v51 = vsel %vm971_vm13, %v959_v12, 0.0 }
 0x1c8   : > { %v1726_v3 = vpop.eup %1725  ;;  %v982_v36 = vadd.f32 %v974_v57, %v2497_v16  ;;  %v983_v18 = vadd.f32 %v975_v51, %v2505_v7  ;;  %v965_v7 = vsel %vm957_vm11, %v2572_v11, %v948_v41 }
 0x1c9   : > { %v1728_v50 = vpop.eup %1727  ;;  %v1092_v44 = vmul.f32 %v1726_v3, %v1083_v58  ;;  %vm1097_vm3 = vweird.f32 %v1726_v3 }
 0x1ca   : > { %v1107_v61 = vmul.f32 %v1728_v50, %v1084_v29  ;;  %vm1112_vm4 = vweird.f32 %v1728_v50  ;;  %vm1098_vm5 = vmor %vm1096_vm2, %vm1097_vm3 }
 0x1cb   : > { %v1093_v17 = vsub.f32 1.0, %v1092_v44  ;;  %vm1113_vm8 = vmor %vm1111_vm6, %vm1112_vm4 }
 0x1cc   : > { %v1108_v32 = vsub.f32 1.0, %v1107_v61 }
 0x1cd   : > { %v999_v4 = vpop.permute.xlu0 %998  ;;  %v1094_v55 = vmul.f32 %v1726_v3, %v1093_v17  ;;  %v946_v30 = vpop.permute.xlu1 %945 }
 0x1ce   : > { %v1006_v13 = vsel %vm1004_vm14, %v991_v31, %v999_v4  ;;  %v1010_v28 = vsel %vm1004_vm14, %v999_v4, %v991_v31  ;;  %v1109_v40 = vmul.f32 %v1728_v50, %v1108_v32  ;;  %v960_v11 = vsel %vm957_vm11, %v946_v30, %v954_v2 }
 0x1cf   : > { %v1021_v60 = vsel %vm1017_vm15, %v1006_v13, 0.0  ;;  %v1022_v16 = vsel %vm1018_vm1, %v1010_v28, 0.0  ;;  %v1095_v23 = vadd.f32 %v1726_v3, %v1094_v55  ;;  %v964_v35 = vsel %vm957_vm11, %v954_v2, %v946_v30 }
 0x1d0   : > { %v1029_v54 = vadd.f32 %v1021_v60, %v982_v36  ;;  %v1030_v5 = vadd.f32 %v1022_v16, %v983_v18  ;;  %v1110_v48 = vadd.f32 %v1728_v50, %v1109_v40  ;;  %v978_v31 = vsel %vm970_vm12, %v965_v7, 0.0 }
 0x1d1   : > { %v1099_v6 = vsel %vm1098_vm5, %v1726_v3, %v1095_v23  ;;  %v979_v2 = vsel %vm971_vm13, %v961_v0, 0.0  ;;  %v976_v19 = vsel %vm970_vm12, %v964_v35, 0.0  ;;  %v977_v3 = vsel %vm971_vm13, %v960_v11, 0.0 }
 0x1d2   : > { %v2638_v53 = vadd.f32 %v1041_v37, %v1029_v54  ;;  %v2640_v20 = vadd.f32 %v1041_v37, %v1030_v5  ;;  %v1104_v47 = vsel %vm1101_vm7, %v1103_v21, %v1099_v6  ;;  %v1114_v39 = vsel %vm1113_vm8, %v1728_v50, %v1110_v48 }
 0x1d3   : > { %v1119_v59 = vsel %vm1116_vm9, %v1118_v25, %v1114_v39  ;;  %v2649_v58 = vmul.f32 %v1104_v47, %v2604_v27  ;;  %v986_v44 = vadd.f32 %v978_v31, %v2534_v22  ;;  %v987_v61 = vadd.f32 %v979_v2, %v2537_v38 }
 0x1d4   : > { %v1570_v45 = vmul.f32 -1.442695, %v2638_v53  ;;  %v1571_v41 = vmul.f32 -1.442695, %v2640_v20  ;;  %v2652_v14 = vmul.f32 %v1119_v59, %v2606_v46  ;;  %v1012_v0 = vsel %vm1004_vm14, %v2610_v26, %v2602_v15 }
 0x1d5   : > { %v993_v29 = vpop.permute.xlu0 %992  ;;  %v1001_v27 = vpop.permute.xlu1 %1000  ;;  %v984_v22 = vadd.f32 %v976_v19, %v2519_v43  ;;  %v985_v51 = vadd.f32 %v977_v3, %v2521_v42  ;;  %v1026_v36 = vsel %vm1018_vm1, %v1012_v0, 0.0  ;;  %v1033_v4 = vadd.f32 %v1025_v34, %v986_v44 }
 0x1d6   : > { %1729 = vpow2.f32 %v1570_v45  ;;  %v1219_v12 = vadd.f32 %v2652_v14, %v2649_v58  ;;  %v1007_v46 = vsel %vm1004_vm14, %v993_v29, %v1001_v27  ;;  %v1011_v50 = vsel %vm1004_vm14, %v1001_v27, %v993_v29 }
 0x1d7   : > { %1731 = vpow2.f32 %v1571_v41  ;;  %v1023_v52 = vsel %vm1017_vm15, %v1007_v46, 0.0  ;;  %v1024_v57 = vsel %vm1018_vm1, %v1011_v50, 0.0  ;;  %v1034_v9 = vadd.f32 %v1026_v36, %v987_v61 }
 0x1d8   : > { %1220 = vadd.xlane.f32.xlu2 %v1219_v12  ;;  %v1031_v49 = vadd.f32 %v1023_v52, %v984_v22  ;;  %v1032_v32 = vadd.f32 %v1024_v57, %v985_v51 }
 0x1dc   : > { %v1730_v17 = vpop.eup %1729 }
 0x1dd   : > { %v1732_v10 = vpop.eup %1731  ;;  %v1085_v38 = vadd.f32 1.0, %v1730_v17  ;;  %v1045_v55 = vpop.permute.xlu0 %1044 }
 0x1de   : > { %v1086_v1 = vadd.f32 1.0, %v1732_v10  ;;  %v2688_v15 = vadd.f32 %v1045_v55, %v1031_v49  ;;  %v2690_v43 = vadd.f32 %v1045_v55, %v1032_v32  ;;  %v1049_v42 = vpop.permute.xlu1 %1048 }
 0x1df   : > { %1733 = vrcp.f32 %v1085_v38  ;;  %v2692_v63 = vadd.f32 %v1049_v42, %v1033_v4  ;;  %v2694_v26 = vadd.f32 %v1049_v42, %v1034_v9  ;;  %v1130_v7 = vand.u32 2147483647, %v1085_v38 }
 0x1e0   : > { %1735 = vrcp.f32 %v1086_v1  ;;  %v1572_v18 = vmul.f32 -1.442695, %v2688_v15  ;;  %v1573_v33 = vmul.f32 -1.442695, %v2690_v43  ;;  %v1132_v6 = vand.u32 2147483648, %v1085_v38 }
 0x1e1   : > { %v1574_v13 = vmul.f32 -1.442695, %v2692_v63  ;;  %v1575_v28 = vmul.f32 -1.442695, %v2694_v26  ;;  %v1145_v48 = vand.u32 2147483647, %v1086_v1  ;;  %vm1126_vm12 = vweird.f32 %v1085_v38 }
 0x1e2   : > { %1737 = vpow2.f32 %v1572_v18  ;;  %v1147_v47 = vand.u32 2147483648, %v1086_v1  ;;  %v1133_v31 = vor.u32 1.1754944e-38, %v1132_v6  ;;  %vm1141_vm14 = vweird.f32 %v1086_v1 }
 0x1e3   : > { %1739 = vpow2.f32 %v1573_v33  ;;  %vm1131_vm15 = vcmp.eq.f32.partialorder %v1130_v7, 8.507059e+37  ;;  %vm1146_vm2 = vcmp.eq.f32.partialorder %v1145_v48, 8.507059e+37 }
 0x1e4   : > { %1741 = vpow2.f32 %v1574_v13  ;;  %v1148_v3 = vor.u32 1.1754944e-38, %v1147_v47 }
 0x1e5   : > { %v1734_v40 = vpop.eup %1733  ;;  %1743 = vpow2.f32 %v1575_v28 }
 0x1e6   : > { %v1736_v30 = vpop.eup %1735  ;;  %v1122_v60 = vmul.f32 %v1734_v40, %v1085_v38  ;;  %vm1127_vm10 = vweird.f32 %v1734_v40 }
 0x1e7   : > { %v1137_v16 = vmul.f32 %v1736_v30, %v1086_v1  ;;  %vm1142_vm11 = vweird.f32 %v1736_v30  ;;  %vm1128_vm13 = vmor %vm1126_vm12, %vm1127_vm10 }
 0x1e8   : > { %v1738_v37 = vpop.eup %1737  ;;  %v1123_v23 = vsub.f32 1.0, %v1122_v60  ;;  %vm1143_vm1 = vmor %vm1141_vm14, %vm1142_vm11 }
 0x1e9   : > { %v1740_v54 = vpop.eup %1739  ;;  %v2700_v5 = vadd.f32 1.0, %v1738_v37  ;;  %v1138_v21 = vsub.f32 1.0, %v1137_v16 }
 0x1ea   : > { %v1742_v25 = vpop.eup %1741  ;;  %v2702_v11 = vadd.f32 1.0, %v1740_v54  ;;  %v1124_v35 = vmul.f32 %v1734_v40, %v1123_v23 }
 0x1eb   : > { %v1744_v39 = vpop.eup %1743  ;;  %v2704_v45 = vadd.f32 1.0, %v1742_v25  ;;  %1745 = vrcp.f32 %v2700_v5  ;;  %v1139_v41 = vmul.f32 %v1736_v30, %v1138_v21  ;;  %vm1156_vm3 = vweird.f32 %v2700_v5 }
 0x1ec   : > { %v2707_v59 = vadd.f32 1.0, %v1744_v39  ;;  %1747 = vrcp.f32 %v2702_v11  ;;  %v1125_v29 = vadd.f32 %v1734_v40, %v1124_v35  ;;  %v1160_v22 = vand.u32 2147483647, %v2700_v5 }
 0x1ed   : > { %1749 = vrcp.f32 %v2704_v45  ;;  %v1140_v2 = vadd.f32 %v1736_v30, %v1139_v41  ;;  %v1190_v44 = vand.u32 2147483647, %v2704_v45  ;;  %v1192_v62 = vand.u32 2147483648, %v2704_v45 }
 0x1ee   : > { %1751 = vrcp.f32 %v2707_v59  ;;  %v1129_v19 = vsel %vm1128_vm13, %v1734_v40, %v1125_v29  ;;  %vm1186_vm4 = vweird.f32 %v2704_v45  ;;  %vm1201_vm5 = vweird.f32 %v2707_v59 }
 0x1ef   : > { %v1134_v27 = vsel %vm1131_vm15, %v1133_v31, %v1129_v19  ;;  %v1144_v12 = vsel %vm1143_vm1, %v1736_v30, %v1140_v2  ;;  %vm2729_vm6 = vcmp.eq.f32.partialorder %v1190_v44, 8.507059e+37  ;;  %v1193_v32 = vor.u32 1.1754944e-38, %v1192_v62  ;;  %v1243_v62 = vld [vmem:[%s2860_s4 + $0x8] sm:$0xff] }
 0x1f0   : > { %v1149_v46 = vsel %vm1146_vm2, %v1148_v3, %v1144_v12  ;;  %v2713_v50 = vmul.f32 %v1134_v27, %v2638_v53  ;;  %v1205_v10 = vand.u32 2147483647, %v2707_v59  ;;  %v1207_v4 = vand.u32 2147483648, %v2707_v59 }
 0x1f1   : > { %v1746_v52 = vpop.eup %1745  ;;  %v2718_v57 = vmul.f32 %v1149_v46, %v2640_v20  ;;  %v1162_v55 = vand.u32 2147483648, %v2700_v5  ;;  %v1177_v18 = vand.u32 2147483648, %v2702_v11  ;;  %v1175_v28 = vand.u32 2147483647, %v2702_v11 }
 0x1f2   : > { %v1748_v61 = vpop.eup %1747  ;;  %v1152_v0 = vmul.f32 %v1746_v52, %v2700_v5  ;;  %vm1157_vm7 = vweird.f32 %v1746_v52  ;;  %vm1171_vm10 = vweird.f32 %v2702_v11  ;;  %vm1161_vm13 = vcmp.eq.f32.partialorder %v1160_v22, 8.507059e+37 }
 0x1f3   : > { %v1750_v51 = vpop.eup %1749  ;;  %v1222_v53 = vadd.f32 %v2718_v57, %v2713_v50  ;;  %v1167_v17 = vmul.f32 %v1748_v61, %v2702_v11  ;;  %vm1172_vm8 = vweird.f32 %v1748_v61  ;;  %vm1158_vm12 = vmor %vm1156_vm3, %vm1157_vm7  ;;  %v1163_v16 = vor.u32 1.1754944e-38, %v1162_v55 }
 0x1f4   : > { %v1752_v34 = vpop.eup %1751  ;;  %v1182_v20 = vmul.f32 %v1750_v51, %v2704_v45  ;;  %v1153_v36 = vsub.f32 1.0, %v1152_v0  ;;  %vm1187_vm9 = vweird.f32 %v1750_v51  ;;  %vm1173_vm14 = vmor %vm1171_vm10, %vm1172_vm8  ;;  %v1178_v54 = vor.u32 1.1754944e-38, %v1177_v18 }
 0x1f5   : > { %1223 = vadd.xlane.f32.xlu1 %v1222_v53  ;;  %v1197_v38 = vmul.f32 %v1752_v34, %v2707_v59  ;;  %v1168_v1 = vsub.f32 1.0, %v1167_v17  ;;  %vm1202_vm11 = vweird.f32 %v1752_v34  ;;  %vm1188_vm15 = vmor %vm1186_vm4, %vm1187_vm9  ;;  %vm1176_vm1 = vcmp.eq.f32.partialorder %v1175_v28, 8.507059e+37 }
 0x1f6   : > { %v1183_v9 = vsub.f32 1.0, %v1182_v20  ;;  %v1154_v42 = vmul.f32 %v1746_v52, %v1153_v36  ;;  %vm1203_vm2 = vmor %vm1201_vm5, %vm1202_vm11  ;;  %v1208_v5 = vor.u32 1.1754944e-38, %v1207_v4  ;;  %vm1206_vm3 = vcmp.eq.f32.partialorder %v1205_v10, 8.507059e+37  ;;  %v1245_v20 = vld [vmem:[%s2860_s4 + $0x18] sm:$0xff] }
 0x1f7   : > { %v1198_v33 = vsub.f32 1.0, %v1197_v38  ;;  %v1169_v13 = vmul.f32 %v1748_v61, %v1168_v1  ;;  %v1860_v2 = vmov 256.0  }
 0x1f8   : > { %v1184_v40 = vmul.f32 %v1750_v51, %v1183_v9  ;;  %v1155_v30 = vadd.f32 %v1746_v52, %v1154_v42  ;;  %1753 = vrcp.f32 %v1860_v2  ;;  %v1287_v2 = vld [vmem:[%s2862_s6 + $0x10] sm:$0xff] }
 0x1f9   : > { %v1199_v60 = vmul.f32 %v1752_v34, %v1198_v33  ;;  %v1170_v37 = vadd.f32 %v1748_v61, %v1169_v13 }
 0x1fa   : > { %v1185_v23 = vadd.f32 %v1750_v51, %v1184_v40  ;;  %v1159_v7 = vsel %vm1158_vm12, %v1746_v52, %v1155_v30  ;;  %v1263_v30 = vld [vmem:[%s2861_s5] sm:$0x1] }
 0x1fb   : > { %v1200_v6 = vadd.f32 %v1752_v34, %v1199_v60  ;;  %v1164_v21 = vsel %vm1161_vm13, %v1163_v16, %v1159_v7  ;;  %v1174_v48 = vsel %vm1173_vm14, %v1748_v61, %v1170_v37  ;;  %v1242_v61 = vld [vmem:[%s2860_s4] sm:$0xff] }
 0x1fc   : > { %v1189_v25 = vsel %vm1188_vm15, %v1750_v51, %v1185_v23  ;;  %v1179_v11 = vsel %vm1176_vm1, %v1178_v54, %v1174_v48  ;;  %v2748_v35 = vmul.f32 %v1164_v21, %v2688_v15  ;;  %v1244_v51 = vld [vmem:[%s2860_s4 + $0x10] sm:$0xff] }
 0x1fd   : > { %v1194_v47 = vsel %vm2729_vm6, %v1193_v32, %v1189_v25  ;;  %v1204_v39 = vsel %vm1203_vm2, %v1752_v34, %v1200_v6  ;;  %v2753_v45 = vmul.f32 %v1179_v11, %v2690_v43 }
 0x1fe   : > { %v1209_v41 = vsel %vm1206_vm3, %v1208_v5, %v1204_v39  ;;  %v2756_v29 = vmul.f32 %v1194_v47, %v2692_v63  ;;  %v1754_v19 = vpop.eup %1753 }
 0x1ff   : > { %v2759_v59 = vmul.f32 %v1209_v41, %v2694_v26  ;;  %v1225_v31 = vadd.f32 %v2753_v45, %v2748_v35  ;;  %v1232_v43 = vmul.f32 256.0, %v1754_v19  ;;  %vm1236_vm4 = vweird.f32 %v1754_v19 }
 0x201   : > { %v1228_v15 = vadd.f32 %v2759_v59, %v2756_v29  ;;  %1226 = vadd.xlane.f32.xlu0 %v1225_v31  ;;  %v1233_v3 = vsub.f32 1.0, %v1232_v43 }
 0x203   : > { %1229 = vadd.xlane.f32.xlu2 %v1228_v15  ;;  %v1234_v27 = vmul.f32 %v1754_v19, %v1233_v3  ;;  %v1288_v15 = vld [vmem:[%s2862_s6 + $0x18] sm:$0xff] }
 0x205   : > { %v1235_v12 = vadd.f32 %v1754_v19, %v1234_v27 }
 0x207   : > { %v1237_v46 = vsel %vm1236_vm4, %v1754_v19, %v1235_v12  ;;  %v1285_v19 = vld [vmem:[%s2862_s6] sm:$0xff] }
 0x24b   : > { %v1221_v26 = vpop.xlane.xlu2 %1220 }
 0x24c   : > { %v1238_v52 = vmul.f32 %v1237_v46, %v1221_v26 }
 0x24e   : > { %v1246_v22 = vmul.f32 %v1242_v61, %v1238_v52  ;;  %v1861_v61 = vmov 11  }
 0x24f   : > { %1684 = vset.pattern.permute.xlu1 %v1861_v61  ;;  %1685 = vset.pattern.permute.xlu2 %v1861_v61 }
 0x250   : > { %v1250_v32 = vsel %vm362_vm0, %v1246_v22, 0.0  ;;  %1686 = vset.pattern.permute.xlu0 %v1861_v61 }
 0x268   : > { %v1224_v63 = vpop.xlane.xlu1 %1223 }
 0x269   : > { %v1239_v44 = vmul.f32 %v1237_v46, %v1224_v63 }
 0x26b   : > { %v1247_v0 = vmul.f32 %v1243_v62, %v1239_v44  ;;  %v1286_v44 = vld [vmem:[%s2862_s6 + $0x8] sm:$0xff] }
 0x26d   : > { %v1251_v17 = vsel %vm362_vm0, %v1247_v0, 0.0 }
 0x26e   : > { %v1252_v38 = vadd.f32 %v1251_v17, %v1250_v32 }
 0x274   : > { %v1227_v53 = vpop.xlane.xlu0 %1226 }
 0x275   : > { %v1240_v34 = vmul.f32 %v1237_v46, %v1227_v53 }
 0x276   : > { %v1230_v49 = vpop.xlane.xlu2 %1229 }
 0x277   : > { %v1248_v10 = vmul.f32 %v1244_v51, %v1240_v34  ;;  %v1241_v36 = vmul.f32 %v1237_v46, %v1230_v49  ;;  %v1778_v34 = vld [vmem:[%s2859_s3] sm:$0xff] }
 0x279   : > { %v1253_v4 = vsel %vm362_vm0, %v1248_v10, 0.0  ;;  %v1249_v55 = vmul.f32 %v1245_v20, %v1241_v36 }
 0x27a   : > { %v1254_v1 = vadd.f32 %v1253_v4, %v1252_v38 }
 0x27b   : > { %v1255_v9 = vsel %vm362_vm0, %v1249_v55, 0.0 }
 0x27c   : > { %v1256_v42 = vadd.f32 %v1255_v9, %v1254_v1 }
 0x27e   : > { %v1257_v18 = vrot.slane %v1256_v42, 4 }
 0x280   : > { %v1258_v33 = vadd.f32 %v1257_v18, %v1256_v42 }
 0x282   : > { %v1259_v13 = vrot.slane %v1258_v33, 2 }
 0x284   : > { %v1260_v28 = vadd.f32 %v1259_v13, %v1258_v33 }
 0x286   : > { %v1261_v40 = vrot.slane %v1260_v28, 1 }
 0x288   : > { %v1262_v60 = vadd.f32 %v1261_v40, %v1260_v28 }
 0x28a   : > { %v1264_v16 = vadd.f32 %v1263_v30, %v1262_v60 }
 0x28c   : > { %v1576_v37 = vmul.f32 -1.442695, %v1264_v16 }
 0x28e   : > { %1755 = vpow2.f32 %v1576_v37 }
 0x294   : > { %v1756_v23 = vpop.eup %1755 }
 0x295   : > { %v1268_v7 = vadd.f32 1.0, %v1756_v23 }
 0x297   : > { %1757 = vrcp.f32 %v1268_v7  ;;  %v1280_v48 = vand.u32 2147483648, %v1268_v7  ;;  %v1278_v5 = vand.u32 2147483647, %v1268_v7  ;;  %vm1274_vm6 = vweird.f32 %v1268_v7 }
 0x299   : > { %v1281_v47 = vor.u32 1.1754944e-38, %v1280_v48  ;;  %vm1279_vm8 = vcmp.eq.f32.partialorder %v1278_v5, 8.507059e+37 }
 0x29d   : > { %v1758_v54 = vpop.eup %1757 }
 0x29e   : > { %v1270_v6 = vmul.f32 %v1758_v54, %v1268_v7  ;;  %vm1275_vm5 = vweird.f32 %v1758_v54 }
 0x29f   : > { %vm1276_vm7 = vmor %vm1274_vm6, %vm1275_vm5 }
 0x2a0   : > { %v1271_v21 = vsub.f32 1.0, %v1270_v6 }
 0x2a2   : > { %v1272_v25 = vmul.f32 %v1758_v54, %v1271_v21 }
 0x2a4   : > { %v1273_v11 = vadd.f32 %v1758_v54, %v1272_v25 }
 0x2a6   : > { %v1277_v39 = vsel %vm1276_vm7, %v1758_v54, %v1273_v11 }
 0x2a7   : > { %v1282_v41 = vsel %vm1279_vm8, %v1281_v47, %v1277_v39 }
 0x2a8   : > { %v1284_v31 = vmul.f32 %v1282_v41, %v1264_v16 }
 0x2aa   : > { %v1289_v43 = vperm.slane %v1284_v31, 0 }
 0x2ac   : > { %v1293_v3 = vmul.f32 %v1289_v43, %v1288_v15  ;;  %v1292_v27 = vmul.f32 %v1289_v43, %v1287_v2  ;;  %v1290_v12 = vmul.f32 %v1289_v43, %v1285_v19  ;;  %v1291_v62 = vmul.f32 %v1289_v43, %v1286_v44 }
 0x2ae   : > { %v1303_v63 = vsel %vm362_vm0, %v1293_v3, 0.0  ;;  %v1300_v46 = vsel %vm362_vm0, %v1292_v27, 0.0  ;;  %v1294_v26 = vsel %vm362_vm0, %v1290_v12, 0.0  ;;  %v1297_v52 = vsel %vm362_vm0, %v1291_v62, 0.0 }
 0x2af   : > { %1304 = vadd.xlane.f32.xlu2 %v1303_v63  ;;  %1301 = vadd.xlane.f32.xlu1 %v1300_v46 }
 0x2b0   : > { %1295 = vadd.xlane.f32.xlu0 %v1294_v26 }
 0x2b7   : > { %1298 = vadd.xlane.f32.xlu2 %v1297_v52 }
 0x322   : > { %v1305_v0 = vpop.xlane.xlu2 %1304  ;;  %v1302_v22 = vpop.xlane.xlu1 %1301 }
 0x323   : > { %v1309_v51 = vadd.f32 %v2561_v56, %v1305_v0  ;;  %v1308_v53 = vadd.f32 %v2549_v8, %v1302_v22  ;;  %v1296_v17 = vpop.xlane.xlu0 %1295 }
 0x324   : > { %v1306_v20 = vadd.f32 %v1778_v34, %v1296_v17  ;;  %v2913_v34 = vmov 0  }
 0x325   : > { %v1580_v49 = vmul.f32 -1.442695, %v1309_v51  ;;  %v1579_v32 = vmul.f32 -1.442695, %v1308_v53 }
 0x326   : > { %v1577_v10 = vmul.f32 -1.442695, %v1306_v20  ;;  %v1415_v20 = vld [vmem:[%s2864_s8] sm:$0xff] }
 0x327   : > { %1759 = vpow2.f32 %v1580_v49 }
 0x328   : > { %1761 = vpow2.f32 %v1579_v32 }
 0x329   : > { %1763 = vpow2.f32 %v1577_v10 }
 0x32a   : > { %v1299_v36 = vpop.xlane.xlu2 %1298 }
 0x32b   : > { %v1307_v38 = vadd.f32 %v2555_v24, %v1299_v36 }
 0x32d   : > { %v1760_v4 = vpop.eup %1759  ;;  %v1578_v55 = vmul.f32 -1.442695, %v1307_v38 }
 0x32e   : > { %v1762_v56 = vpop.eup %1761  ;;  %v1325_v1 = vadd.f32 1.0, %v1760_v4 }
 0x32f   : > { %v1764_v8 = vpop.eup %1763  ;;  %v1324_v9 = vadd.f32 1.0, %v1762_v56  ;;  %1765 = vpow2.f32 %v1578_v55 }
 0x330   : > { %1767 = vrcp.f32 %v1325_v1  ;;  %v1322_v42 = vadd.f32 1.0, %v1764_v8  ;;  %v1380_v37 = vand.u32 2147483647, %v1325_v1  ;;  %v1382_v23 = vand.u32 2147483648, %v1325_v1 }
 0x331   : > { %1769 = vrcp.f32 %v1324_v9  ;;  %v1367_v6 = vand.u32 2147483648, %v1324_v9  ;;  %v1365_v25 = vand.u32 2147483647, %v1324_v9  ;;  %vm1376_vm10 = vweird.f32 %v1325_v1 }
 0x332   : > { %1771 = vrcp.f32 %v1322_v42  ;;  %v1383_v39 = vor.u32 1.1754944e-38, %v1382_v23  ;;  %vm1361_vm12 = vweird.f32 %v1324_v9  ;;  %vm1381_vm13 = vcmp.eq.f32.partialorder %v1380_v37, 8.507059e+37 }
 0x333   : > { %v1368_v15 = vor.u32 1.1754944e-38, %v1367_v6  ;;  %vm1366_vm15 = vcmp.eq.f32.partialorder %v1365_v25, 8.507059e+37  ;;  %vm1331_vm2 = vweird.f32 %v1322_v42  ;;  %v1337_v46 = vand.u32 2147483648, %v1322_v42 }
 0x334   : > { %v1335_v62 = vand.u32 2147483647, %v1322_v42 }
 0x335   : > { %v1766_v18 = vpop.eup %1765  ;;  %v1338_v22 = vor.u32 1.1754944e-38, %v1337_v46 }
 0x336   : > { %v1768_v33 = vpop.eup %1767  ;;  %v1323_v13 = vadd.f32 1.0, %v1766_v18  ;;  %vm1336_vm8 = vcmp.eq.f32.partialorder %v1335_v62, 8.507059e+37  ;;  %v1780_v18 = vld [vmem:[%s1979_s29 + $0x8] sm:$0xff] }
 0x337   : > { %v1770_v28 = vpop.eup %1769  ;;  %v1372_v40 = vmul.f32 %v1768_v33, %v1325_v1  ;;  %vm1377_vm0 = vweird.f32 %v1768_v33 }
 0x338   : > { %v1772_v30 = vpop.eup %1771  ;;  %1773 = vrcp.f32 %v1323_v13  ;;  %v1357_v60 = vmul.f32 %v1770_v28, %v1324_v9  ;;  %vm1362_vm9 = vweird.f32 %v1770_v28  ;;  %vm1378_vm11 = vmor %vm1376_vm10, %vm1377_vm0  ;;  %v1352_v63 = vand.u32 2147483648, %v1323_v13  ;;  %v1779_v9 = vld [vmem:[%s1979_s29] sm:$0xff] }
 0x339   : > { %v1373_v24 = vsub.f32 1.0, %v1372_v40  ;;  %v1327_v16 = vmul.f32 %v1772_v30, %v1322_v42  ;;  %vm1363_vm14 = vmor %vm1361_vm12, %vm1362_vm9  ;;  %vm1332_vm1 = vweird.f32 %v1772_v30  ;;  %v1350_v44 = vand.u32 2147483647, %v1323_v13 }
 0x33a   : > { %v1358_v7 = vsub.f32 1.0, %v1357_v60  ;;  %vm1333_vm4 = vmor %vm1331_vm2, %vm1332_vm1  ;;  %vm1346_vm5 = vweird.f32 %v1323_v13  ;;  %v1353_v0 = vor.u32 1.1754944e-38, %v1352_v63  ;;  %vm1421_vm0 = vcmask 261120  }
 0x33b   : > { %v1374_v54 = vmul.f32 %v1768_v33, %v1373_v24  ;;  %v1328_v21 = vsub.f32 1.0, %v1327_v16  ;;  %vm1351_vm7 = vcmp.eq.f32.partialorder %v1350_v44, 8.507059e+37 }
 0x33c   : > { %v1359_v48 = vmul.f32 %v1770_v28, %v1358_v7 }
 0x33d   : > { %v1375_v5 = vadd.f32 %v1768_v33, %v1374_v54  ;;  %v1329_v11 = vmul.f32 %v1772_v30, %v1328_v21 }
 0x33e   : > { %v1774_v47 = vpop.eup %1773  ;;  %v1360_v41 = vadd.f32 %v1770_v28, %v1359_v48 }
 0x33f   : > { %v1379_v31 = vsel %vm1378_vm11, %v1768_v33, %v1375_v5  ;;  %v1342_v2 = vmul.f32 %v1774_v47, %v1323_v13  ;;  %v1330_v12 = vadd.f32 %v1772_v30, %v1329_v11  ;;  %vm1347_vm3 = vweird.f32 %v1774_v47 }
 0x340   : > { %v1384_v19 = vsel %vm1381_vm13, %v1383_v39, %v1379_v31  ;;  %v1364_v43 = vsel %vm1363_vm14, %v1770_v28, %v1360_v41  ;;  %vm1348_vm6 = vmor %vm1346_vm5, %vm1347_vm3 }
 0x341   : > { %1403 = vperm.xlu1 %1684, %v1384_v19   ;;  %v1369_v3 = vsel %vm1366_vm15, %v1368_v15, %v1364_v43  ;;  %v1343_v27 = vsub.f32 1.0, %v1342_v2  ;;  %v1334_v61 = vsel %vm1333_vm4, %v1772_v30, %v1330_v12 }
 0x342   : > { %1398 = vperm.xlu2 %1685, %v1369_v3   ;;  %v1339_v17 = vsel %vm1336_vm8, %v1338_v22, %v1334_v61 }
 0x343   : > { %v1344_v26 = vmul.f32 %v1774_v47, %v1343_v27 }
 0x345   : > { %v1345_v52 = vadd.f32 %v1774_v47, %v1344_v26 }
 0x347   : > { %v1349_v51 = vsel %vm1348_vm6, %v1774_v47, %v1345_v52 }
 0x348   : > { %v1354_v53 = vsel %vm1351_vm7, %v1353_v0, %v1349_v51 }
 0x349   : > { %1393 = vperm.xlu0 %1686, %v1354_v53   ;;  %1388 = vperm.xlu1 %1684, %v1339_v17  }
 0x34a   : > { %1687 = vset.pattern.permute.xlu2 %v2913_v34 }
 0x34b   : > { %1418 = vperm.xlu2 %1687, %v1415_v20  }
 0x351   : > { %1688 = vset.pattern.permute.xlu0 %v2913_v34 }
 0x39c   : > { %v1399_v49 = vpop.permute.xlu2 %1398 }
 0x39d   : > { %v1410_v38 = vmul.f32 %v1399_v49, %v2748_v35  ;;  %v1411_v4 = vmul.f32 %v1399_v49, %v2753_v45  ;;  %v1414_v35 = vld [vmem:[%s2863_s7] sm:$0xff] }
 0x3b3   : > { %v1404_v32 = vpop.permute.xlu1 %1403 }
 0x3b4   : > { %v1412_v10 = vmul.f32 %v1404_v32, %v2756_v29  ;;  %v1413_v36 = vmul.f32 %v1404_v32, %v2759_v59 }
 0x3b6   : > { %1437 = vmatpush.msrb.mxu2 %v1412_v10  ;;  %1457 = vmatpush.msrb.mxu3 %v1413_v36 }
 0x3b8   : > { %1438 = vmatpush.msrb.mxu2 %v1410_v38  ;;  %1458 = vmatpush.msrb.mxu3 %v1411_v4 }
 0x3bb   : > { %v1389_v55 = vpop.permute.xlu1 %1388  ;;  %v1394_v56 = vpop.permute.xlu0 %1393 }
 0x3bc   : > { %v1408_v1 = vmul.f32 %v1394_v56, %v2713_v50  ;;  %v1409_v8 = vmul.f32 %v1394_v56, %v2718_v57  ;;  %v1406_v29 = vmul.f32 %v1389_v55, %v2649_v58  ;;  %v1407_v59 = vmul.f32 %v1389_v55, %v2652_v14  ;;  %v1419_v50 = vpop.permute.xlu2 %1418 }
 0x3be   : > { %1439 = vmatpush.msrb.mxu2 %v1408_v1  ;;  %1459 = vmatpush.msrb.mxu3 %v1409_v8 }
 0x3c0   : > { %1440 = vmatpush.msrb.mxu2 %v1406_v29  ;;  %1460 = vmatpush.msrb.mxu3 %v1407_v59 }
 0x3c1   : > { %1581 = vmatmul.msk.f32.vlgmr.msrb.gmra.mxu2 %vm1421_vm0, %v1414_v35  ;;  %1582 = vmatmul.msk.f32.vlgmr.msrb.gmra.mxu3 %vm1421_vm0, %v1414_v35 }
 0x444   : > { %v1442_v58 = vpop.f32.mrf.mxu2  ;;  %v1462_v14 = vpop.f32.mrf.mxu3 }
 0x445   : > { %v1443_v57 = vadd.f32 %v1442_v58, %v1419_v50  ;;  %v1463_v45 = vadd.f32 %v1462_v14, %v1419_v50 }
 0x447   : > { %v1465_v42 = vadd.f32 %v1779_v9, %v1443_v57  ;;  %v1466_v33 = vadd.f32 %v1780_v18, %v1463_v45 }
 0x449   : > { %1467 = vst [vmem:[%s325_s28] sm:$0xff] %v1465_v42 }
 0x44a   : > { %1468 = vst [vmem:[%s325_s28 + $0x8] sm:$0xff] %v1466_v33 }
 0x44b   : > { %1808 = shalt.err (!%p1805_p3)
}
 0x44c   : > { %1592 = dma.vmem_to_hbm [thread:$0]  (%p1950_p5), %s1484_s14, 256, %s1486_s16, %s1470_s13  }
 0x44d PF: > { %p1598_p4 = scmp.ge.s32.totalorder %s1843_s12, 2  ;;  %s1497_s29 = sand.u32 1, %s1831_s30  }
 0x44e   : > { %s1498_s22 = scalar_lea.sflag [#allocation3], %s1497_s29 }
 0x44f   : > { %p1595_p7 = pnand %p1598_p4, %p1954_p6 }
 0x451   : > { %p1596_p8 = pneg %p1595_p7 }
 0x453   : > { %1826 = dma.done.wait (%p1596_p8), %s1498_s22, 256  }
 0x454   : > { %1828 = vsyncadd (%p1596_p8), %s1498_s22, 4294967040  ;;  %p19_p9 = scmp.ge.s32.totalorder %s1937_s15, 4   ;;  %s2914_s30 = smov %s1835_s10 }
 0x455   : > { %s2915_s10 = smov %s1839_s11  ;;  %s2916_s11 = smov %s1948_s18 }
 0x456   : > { %s2917_s12 = smov %s1937_s15  ;;  %21 = sbr.rel (!%p19_p9) target bundleno = 3 (0x3), region = 91 }
 0x45b   :  { %1504 = vsyncpa [#allocation3], 1 }
 0x45c   :  { %1506 = vsyncpa [#allocation3 + $0x1], 1 }

</bundles_post_ra>
